<compile_context>
chip_gen: v7x
topology: tpu7x:2x2x1
jax: 0.10.0
libtpu: 0.0.40
codegen_flags: <defaults>
</compile_context>

<pallas_src>
import functools

import jax
import jax.numpy as jnp
from jax.experimental import pallas as pl
from jax.experimental.pallas import tpu as pltpu


def _fvq_kernel(z_ref, w_in_ref, b_in_ref, cbs_ref, woq_ref, b_out_ref,
                zq_ref, ze_ref, ind_ref, *, n_chunks, k_chunk, codebook_dim):
    """One (batch, time-tile) grid step, channel-first (channels on sublanes,
    time on lanes) so every output store is lane-dense along T."""
    x = z_ref[0]                                                # (Din, tT) f32

    # in_project (weight-normed 1x1 conv) with one extra augmented row that is
    # exactly 1.0 (zero weights + bias 1.0); the score matmul uses it to absorb
    # the -0.5*||c||^2 bias / K-padding mask as a single extra MXU row.
    ze_aug = jnp.dot(w_in_ref[...], x,
                     preferred_element_type=jnp.float32) + b_in_ref[...]
    # ze_aug: (Dcb+1, tT)

    tT = x.shape[-1]
    din = zq_ref.shape[1]
    lookup_dtype = woq_ref.dtype
    iota_k = jax.lax.broadcasted_iota(jnp.int32, (k_chunk, tT), 0)  # hoisted

    def chunk_step(c, carry):
        best, idx, zout = carry
        # score = codebook_chunk . z_e (+ bias row): contract dim 0 of both
        #   (Dcb+1, Kc) x (Dcb+1, tT) -> (Kc, tT)   (codebook stays lane-dense)
        score = jax.lax.dot_general(
            cbs_ref[c], ze_aug, (((0,), (0,)), ((), ())),
            preferred_element_type=jnp.float32)
        local_best = jnp.max(score, axis=0, keepdims=True)          # (1, tT)
        hit = score >= local_best
        local_arg = jnp.min(jnp.where(hit, iota_k, k_chunk),
                            axis=0, keepdims=True)                  # first index
        onehot = (iota_k == local_arg).astype(lookup_dtype)         # (Kc, tT)
        # Fused codebook lookup + out_project: (Din, Kc) @ (Kc, tT) -> (Din, tT)
        cand = jnp.dot(woq_ref[c], onehot,
                       preferred_element_type=jnp.float32)
        take = local_best > best        # strict '>': earlier chunk wins ties
        best = jnp.where(take, local_best, best)
        idx = jnp.where(take, c * k_chunk + local_arg, idx)
        zout = jnp.where(take, cand, zout)
        return best, idx, zout

    init = (jnp.full((1, tT), -jnp.inf, jnp.float32),
            jnp.zeros((1, tT), jnp.int32),
            jnp.zeros((din, tT), jnp.float32))
    if n_chunks == 1:
        _, idx, zout = chunk_step(0, init)
    else:
        _, idx, zout = jax.lax.fori_loop(0, n_chunks, chunk_step, init,
                                         unroll=n_chunks <= 4)

    zq_ref[0] = zout + b_out_ref[...]              # out-projected z_q (f32)
    ze_ref[0] = ze_aug[:codebook_dim, :]           # projected latents
    ind_ref[0] = idx                               # codebook indices (int32)


def _weight_norm(v, g):
    # nn.utils.weight_norm(Conv1d, dim=0): w = g * v / ||v||_{dims (1,2)}
    norm = jnp.sqrt(jnp.sum(v * v, axis=(1, 2), keepdims=True))
    return (g * v / norm)[:, :, 0]                 # (out, in), kernel_size=1 dropped


def _const_spec(arr, single_buffer):
    zeros = (0,) * arr.ndim
    index_map = lambda b, t: zeros
    if single_buffer:
        # Grid-invariant operand: a second pipeline buffer is pure VMEM waste.
        return pl.BlockSpec(arr.shape, index_map, pipeline_mode=pl.Buffered(1))
    return pl.BlockSpec(arr.shape, index_map)


def factorized_vq_forward(z, params, *, commitment=0.005, codebook_loss_weight=1.0,
                          use_l2_normlize=True, time_tile_cap=None, k_chunk=512,
                          lookup_matmul_dtype=jnp.float32):
    """z: (B, Din, T) f32. Returns (z_q, commit_loss, codebook_loss, indices, z_e)
    with PyTorch shapes (B,Din,T), (B,), (B,), (B,T), (B,Dcb,T)."""
    z = z.astype(jnp.float32)
    B, Din, T = z.shape
    w_in = _weight_norm(params["in_v"], params["in_g"])          # (Dcb, Din)
    w_out = _weight_norm(params["out_v"], params["out_g"])       # (Din, Dcb)
    codebook = params["codebook"].astype(jnp.float32)            # (K, Dcb)
    K, Dcb = codebook.shape

    # ---- loop-invariant codebook prep (wrapper-side, once) -------------------
    if use_l2_normlize:
        norm = jnp.linalg.norm(codebook, axis=1, keepdims=True)
        score_rows = codebook / jnp.maximum(norm, 1e-12)         # F.normalize
        bias = jnp.zeros((K,), jnp.float32)                      # pure cosine score
    else:
        score_rows = codebook
        bias = -0.5 * jnp.sum(codebook * codebook, axis=1)       # fold -0.5*||c||^2

    kc = int(min(k_chunk, K))
    n_chunks = -(-K // kc)
    k_pad = n_chunks * kc
    if k_pad > K:                                                # pad K, mask pads
        score_rows = jnp.pad(score_rows, ((0, k_pad - K), (0, 0)))
        bias = jnp.concatenate([bias, jnp.full((k_pad - K,), -1e30, jnp.float32)])
    cbs = jnp.concatenate([score_rows, bias[:, None]], axis=1)   # (K_pad, Dcb+1)
    cbs = cbs.reshape(n_chunks, kc, Dcb + 1).transpose(0, 2, 1)  # (nC, Dcb+1, Kc)

    # Fused lookup + out_project weights: W_oq[:, k] = w_out @ codebook[k]
    woq = jnp.dot(w_out, codebook.T)                             # (Din, K)
    if k_pad > K:
        woq = jnp.pad(woq, ((0, 0), (0, k_pad - K)))
    woq = woq.reshape(Din, n_chunks, kc).transpose(1, 0, 2)      # (nC, Din, Kc)
    woq = woq.astype(lookup_matmul_dtype)

    # Augmented in-projection: extra row produces an exact 1.0 per time step.
    w_in_aug = jnp.concatenate([w_in, jnp.zeros((1, Din), jnp.float32)], axis=0)
    b_in_aug = jnp.concatenate([params["in_b"].astype(jnp.float32),
                                jnp.ones((1,), jnp.float32)])[:, None]   # (Dcb+1, 1)
    b_out = params["out_b"].astype(jnp.float32)[:, None]                  # (Din, 1)

    # ---- generation-aware VMEM budget / time tiling --------------------------
    try:
        vmem_cap = int(pltpu.get_tpu_info().vmem_capacity_bytes)
    except Exception:
        vmem_cap = 64 * 1024 * 1024                       # conservative default
    if time_tile_cap is None:
        time_tile_cap = 1024 if vmem_cap >= 96 * 1024 * 1024 else 512
    vmem_limit = max(32 * 1024 * 1024,
                     min(int(0.7 * vmem_cap), 100 * 1024 * 1024))

    if T <= time_tile_cap:
        tT, t_pad = T, T
    else:
        tT = max(128, (time_tile_cap // 128) * 128)       # lane-aligned tile
        t_pad = -(-T // tT) * tT
    nT = t_pad // tT
    z_p = z if t_pad == T else jnp.pad(z, ((0, 0), (0, 0), (0, t_pad - T)))

    # ---- pallas_call ----------------------------------------------------------
    kernel = functools.partial(_fvq_kernel, n_chunks=n_chunks, k_chunk=kc,
                               codebook_dim=Dcb)
    consts = (w_in_aug, b_in_aug, cbs, woq, b_out)

    out_shape = (
        jax.ShapeDtypeStruct((B, Din, t_pad), jnp.float32),   # out-projected z_q
        jax.ShapeDtypeStruct((B, Dcb, t_pad), jnp.float32),   # z_e
        jax.ShapeDtypeStruct((B, 1, t_pad), jnp.int32),       # indices (lane-dense)
    )
    out_specs = (
        pl.BlockSpec((1, Din, tT), lambda b, t: (b, 0, t)),
        pl.BlockSpec((1, Dcb, tT), lambda b, t: (b, 0, t)),
        pl.BlockSpec((1, 1, tT), lambda b, t: (b, 0, t)),
    )

    def _run(single_buffer_consts):
        in_specs = [pl.BlockSpec((1, Din, tT), lambda b, t: (b, 0, t))]
        in_specs += [_const_spec(a, single_buffer_consts) for a in consts]
        outs = pl.pallas_call(
            kernel,
            out_shape=out_shape,
            grid=(B, nT),
            in_specs=in_specs,
            out_specs=out_specs,
            compiler_params=pltpu.CompilerParams(
                dimension_semantics=("parallel", "parallel"),
                vmem_limit_bytes=vmem_limit),
        )(z_p, *consts)
        return jax.block_until_ready(outs)

    try:
        zq, ze, ind = _run(True)        # single-buffer grid-invariant weights
    except Exception:
        zq, ze, ind = _run(False)       # fallback if pl.Buffered(1) unsupported

    zq = zq[:, :, :T]
    ze = ze[:, :, :T]
    indices = ind[:, 0, :T]

    # Losses (training branch of the PyTorch module): values of commit and
    # codebook losses are identical in forward (only detach differs). Computed
    # here from z_e + a small codebook gather (Dcb is tiny), avoiding a per-step
    # scalar writeback from the kernel.
    zq_raw = jnp.transpose(jnp.take(codebook, indices, axis=0), (0, 2, 1))
    mse = jnp.mean((ze - zq_raw) ** 2, axis=(1, 2))
    return zq, mse * commitment, mse * codebook_loss_weight, indices, ze


def _reference(z, params, *, commitment=0.005, codebook_loss_weight=1.0,
               use_l2_normlize=True):
    """Pure-JAX reference mirroring the PyTorch forward (training=True)."""
    w_in = _weight_norm(params["in_v"], params["in_g"])
    w_out = _weight_norm(params["out_v"], params["out_g"])
    codebook = params["codebook"]
    B, Din, T = z.shape
    z_e = jnp.einsum("od,bdt->bot", w_in, z) + params["in_b"][None, :, None]
    enc = jnp.transpose(z_e, (0, 2, 1)).reshape(B * T, -1)
    cb = codebook
    if use_l2_normlize:
        enc = enc / jnp.maximum(jnp.linalg.norm(enc, axis=1, keepdims=True), 1e-12)
        cb = cb / jnp.maximum(jnp.linalg.norm(cb, axis=1, keepdims=True), 1e-12)
    dist = (enc ** 2).sum(1, keepdims=True) - 2 * enc @ cb.T \
        + (cb ** 2).sum(1, keepdims=True).T
    indices = jnp.argmax(-dist, axis=1).reshape(B, T)
    z_q = jnp.transpose(codebook[indices], (0, 2, 1))            # (B, Dcb, T)
    mse = jnp.mean((z_e - z_q) ** 2, axis=(1, 2))
    out = jnp.einsum("od,bdt->bot", w_out, z_q) + params["out_b"][None, :, None]
    return out, mse * commitment, mse * codebook_loss_weight, indices, z_e


if __name__ == "__main__":
    key = jax.random.PRNGKey(0)

    def make_params(key, input_dim, codebook_dim, codebook_size):
        k = jax.random.split(key, 5)
        in_v = jax.random.normal(k[0], (codebook_dim, input_dim, 1), jnp.float32) * 0.1
        in_g = jnp.sqrt(jnp.sum(in_v * in_v, axis=(1, 2), keepdims=True))  # g = ||v||
        in_b = jax.random.normal(k[1], (codebook_dim,), jnp.float32) * 0.01
        out_v = jax.random.normal(k[2], (input_dim, codebook_dim, 1), jnp.float32) * 0.1
        out_g = jnp.sqrt(jnp.sum(out_v * out_v, axis=(1, 2), keepdims=True))
        out_b = jax.random.normal(k[3], (input_dim,), jnp.float32) * 0.01
        codebook = jax.random.normal(k[4], (codebook_size, codebook_dim), jnp.float32)
        return dict(in_v=in_v, in_g=in_g, in_b=in_b, out_v=out_v, out_g=out_g,
                    out_b=out_b, codebook=codebook)

    def check(z, params, *, use_l2, zq_atol=1e-5, **kw):
        outs = jax.block_until_ready(
            factorized_vq_forward(z, params, use_l2_normlize=use_l2, **kw))
        refs = _reference(z, params, use_l2_normlize=use_l2)
        z_q, commit, cbloss, indices, z_e = outs
        rz_q, rcommit, rcbloss, rindices, rz_e = refs
        B, Din, T = z.shape
        Dcb = params["codebook"].shape[1]
        assert z_q.shape == (B, Din, T) and z_e.shape == (B, Dcb, T)
        assert indices.shape == (B, T) and commit.shape == (B,) and cbloss.shape == (B,)
        assert jnp.array_equal(indices, rindices), "indices mismatch"
        assert jnp.allclose(z_e, rz_e, atol=1e-5), "z_e mismatch"
        assert jnp.allclose(z_q, rz_q, atol=zq_atol), "z_q mismatch"
        assert jnp.allclose(commit, rcommit, rtol=1e-4, atol=1e-7), "commit mismatch"
        assert jnp.allclose(cbloss, rcbloss, rtol=1e-4, atol=1e-7), "codebook loss mismatch"

    kA, kB, kz1, kz2 = jax.random.split(key, 4)

    # Config A: single K-chunk, single time tile.
    pA = make_params(kA, input_dim=32, codebook_dim=8, codebook_size=64)
    zA = jax.random.normal(kz1, (2, 32, 16), jnp.float32)
    check(zA, pA, use_l2=True)
    check(zA, pA, use_l2=False)

    # Config B: exercises K chunking + K padding (K=80, Kc=32 -> 3 chunks) and
    # time-axis padding (T=200 -> two 128-wide tiles).
    pB = make_params(kB, input_dim=32, codebook_dim=8, codebook_size=80)
    zB = jax.random.normal(kz2, (2, 32, 200), jnp.float32)
    check(zB, pB, use_l2=True, k_chunk=32, time_tile_cap=128)

    # bf16 operands on the fused lookup/out-project matmul (v6e/v7x option);
    # indices / z_e / losses are unaffected, z_q tolerance loosened.
    check(zA, pA, use_l2=True, lookup_matmul_dtype=jnp.bfloat16, zq_atol=1e-2)

    print("KERNEL_OK")
</pallas_src>

<mosaic_0001>
module attributes {stable_mosaic.version = 11 : i64} {
  func.func @_fvq_kernel(%arg0: i32, %arg1: i32, %arg2: memref<1x32x16xf32, #tpu.memory_space<vmem>>, %arg3: memref<9x32xf32, #tpu.memory_space<vmem>>, %arg4: memref<9x1xf32, #tpu.memory_space<vmem>>, %arg5: memref<1x9x64xf32, #tpu.memory_space<vmem>>, %arg6: memref<1x32x64xf32, #tpu.memory_space<vmem>>, %arg7: memref<32x1xf32, #tpu.memory_space<vmem>>, %arg8: memref<1x32x16xf32, #tpu.memory_space<vmem>>, %arg9: memref<1x8x16xf32, #tpu.memory_space<vmem>>, %arg10: memref<1x1x16xi32, #tpu.memory_space<vmem>>) attributes {dimension_semantics = [#tpu.dimension_semantics<parallel>, #tpu.dimension_semantics<parallel>], iteration_bounds = array<i64: 2, 1>, scalar_prefetch = 0 : i64, scratch_operands = 0 : i64, tpu.core_type = #tpu.core_type<tc>, window_params = [{transform_indices = @transform_0, window_bounds = array<i64: 1, 32, 16>}, {pipeline_mode = #tpu.pipeline_mode<synchronous>, transform_indices = @transform_1, window_bounds = array<i64: 9, 32>}, {pipeline_mode = #tpu.pipeline_mode<synchronous>, transform_indices = @transform_2, window_bounds = array<i64: 9, 1>}, {pipeline_mode = #tpu.pipeline_mode<synchronous>, transform_indices = @transform_3, window_bounds = array<i64: 1, 9, 64>}, {pipeline_mode = #tpu.pipeline_mode<synchronous>, transform_indices = @transform_4, window_bounds = array<i64: 1, 32, 64>}, {pipeline_mode = #tpu.pipeline_mode<synchronous>, transform_indices = @transform_5, window_bounds = array<i64: 32, 1>}, {transform_indices = @transform_6, window_bounds = array<i64: 1, 32, 16>}, {transform_indices = @transform_7, window_bounds = array<i64: 1, 8, 16>}, {transform_indices = @transform_8, window_bounds = array<i64: 1, 1, 16>}]} {
    %c0 = arith.constant 0 : index
    %c0_0 = arith.constant 0 : index
    %c0_1 = arith.constant 0 : index
    %0 = vector.load %arg2[%c0, %c0_0, %c0_1] : memref<1x32x16xf32, #tpu.memory_space<vmem>>, vector<1x32x16xf32>
    %1 = vector.shape_cast %0 : vector<1x32x16xf32> to vector<32x16xf32>
    %c0_2 = arith.constant 0 : index
    %c0_3 = arith.constant 0 : index
    %2 = vector.load %arg3[%c0_2, %c0_3] : memref<9x32xf32, #tpu.memory_space<vmem>>, vector<9x32xf32>
    %cst = arith.constant dense<0.000000e+00> : vector<9x16xf32>
    %3 = tpu.matmul %2, %1, %cst {dimension_numbers = #tpu.dot_dimension_numbers<[1], [0], [0], [1], [0, 0, 1, 1], [], []>} : vector<9x32xf32>, vector<32x16xf32>, vector<9x16xf32> -> vector<9x16xf32>
    %c0_4 = arith.constant 0 : index
    %c0_5 = arith.constant 0 : index
    %4 = vector.load %arg4[%c0_4, %c0_5] : memref<9x1xf32, #tpu.memory_space<vmem>>, vector<9x1xf32>
    %5 = vector.broadcast %4 : vector<9x1xf32> to vector<9x16xf32>
    %6 = arith.addf %3, %5 : vector<9x16xf32>
    %7 = tpu.iota {dimensions = array<i32: 0>} : vector<64x16xi32>
    %cst_6 = arith.constant 0xFF800000 : f32
    %8 = vector.broadcast %cst_6 : f32 to vector<1x16xf32>
    %c0_i32 = arith.constant 0 : i32
    %9 = vector.broadcast %c0_i32 : i32 to vector<1x16xi32>
    %cst_7 = arith.constant 0.000000e+00 : f32
    %10 = vector.broadcast %cst_7 : f32 to vector<32x16xf32>
    %c0_8 = arith.constant 0 : index
    %c0_9 = arith.constant 0 : index
    %c0_10 = arith.constant 0 : index
    %11 = vector.load %arg5[%c0_8, %c0_9, %c0_10] : memref<1x9x64xf32, #tpu.memory_space<vmem>>, vector<1x9x64xf32>
    %12 = vector.shape_cast %11 : vector<1x9x64xf32> to vector<9x64xf32>
    %cst_11 = arith.constant dense<0.000000e+00> : vector<64x16xf32>
    %13 = tpu.matmul %12, %6, %cst_11 {dimension_numbers = #tpu.dot_dimension_numbers<[0], [0], [1], [1], [0, 1, 1, 1], [], []>} : vector<9x64xf32>, vector<9x16xf32>, vector<64x16xf32> -> vector<64x16xf32>
    %cst_12 = arith.constant dense<0xFF800000> : vector<16xf32>
    %14 = vector.multi_reduction <maximumf>, %13, %cst_12 [0] : vector<64x16xf32> to vector<16xf32>
    %15 = vector.shape_cast %14 : vector<16xf32> to vector<1x16xf32>
    %16 = vector.broadcast %15 : vector<1x16xf32> to vector<64x16xf32>
    %17 = arith.cmpf oge, %13, %16 : vector<64x16xf32>
    %c64_i32 = arith.constant 64 : i32
    %18 = vector.broadcast %c64_i32 : i32 to vector<64x16xi32>
    %19 = arith.select %17, %7, %18 : vector<64x16xi1>, vector<64x16xi32>
    %cst_13 = arith.constant dense<2147483647> : vector<16xi32>
    %20 = vector.multi_reduction <minsi>, %19, %cst_13 [0] : vector<64x16xi32> to vector<16xi32>
    %21 = vector.shape_cast %20 : vector<16xi32> to vector<1x16xi32>
    %22 = vector.broadcast %21 : vector<1x16xi32> to vector<64x16xi32>
    %23 = arith.cmpi eq, %7, %22 : vector<64x16xi32>
    %24 = arith.extui %23 : vector<64x16xi1> to vector<64x16xi32>
    %25 = arith.sitofp %24 : vector<64x16xi32> to vector<64x16xf32>
    %c0_14 = arith.constant 0 : index
    %c0_15 = arith.constant 0 : index
    %c0_16 = arith.constant 0 : index
    %26 = vector.load %arg6[%c0_14, %c0_15, %c0_16] : memref<1x32x64xf32, #tpu.memory_space<vmem>>, vector<1x32x64xf32>
    %27 = vector.shape_cast %26 : vector<1x32x64xf32> to vector<32x64xf32>
    %cst_17 = arith.constant dense<0.000000e+00> : vector<32x16xf32>
    %28 = tpu.matmul %27, %25, %cst_17 {dimension_numbers = #tpu.dot_dimension_numbers<[1], [0], [0], [1], [0, 0, 1, 1], [], []>} : vector<32x64xf32>, vector<64x16xf32>, vector<32x16xf32> -> vector<32x16xf32>
    %29 = arith.cmpf ogt, %15, %8 : vector<1x16xf32>
    %c0_i32_18 = arith.constant 0 : i32
    %30 = vector.broadcast %c0_i32_18 : i32 to vector<1x16xi32>
    %31 = arith.addi %30, %21 : vector<1x16xi32>
    %32 = arith.select %29, %31, %9 : vector<1x16xi1>, vector<1x16xi32>
    %33 = vector.shape_cast %29 : vector<1x16xi1> to vector<1x16xi1>
    %34 = vector.broadcast %33 : vector<1x16xi1> to vector<32x16xi1>
    %35 = arith.select %34, %28, %10 : vector<32x16xi1>, vector<32x16xf32>
    %c0_19 = arith.constant 0 : index
    %c0_20 = arith.constant 0 : index
    %36 = vector.load %arg7[%c0_19, %c0_20] : memref<32x1xf32, #tpu.memory_space<vmem>>, vector<32x1xf32>
    %37 = vector.broadcast %36 : vector<32x1xf32> to vector<32x16xf32>
    %38 = arith.addf %35, %37 : vector<32x16xf32>
    %c0_21 = arith.constant 0 : index
    %c0_22 = arith.constant 0 : index
    %c0_23 = arith.constant 0 : index
    %39 = vector.load %arg8[%c0_21, %c0_22, %c0_23] : memref<1x32x16xf32, #tpu.memory_space<vmem>>, vector<1x32x16xf32>
    %40 = vector.shape_cast %39 : vector<1x32x16xf32> to vector<32x16xf32>
    %41 = vector.shape_cast %38 : vector<32x16xf32> to vector<1x32x16xf32>
    tpu.vector_store %arg8[%c0_21, %c0_22, %c0_23], %41 {strides = array<i32>} : memref<1x32x16xf32, #tpu.memory_space<vmem>>, vector<1x32x16xf32>,
    %42 = vector.extract_strided_slice %6 {offsets = [0, 0], sizes = [8, 16], strides = [1, 1]} : vector<9x16xf32> to vector<8x16xf32>
    %c0_24 = arith.constant 0 : index
    %c0_25 = arith.constant 0 : index
    %c0_26 = arith.constant 0 : index
    %43 = vector.load %arg9[%c0_24, %c0_25, %c0_26] : memref<1x8x16xf32, #tpu.memory_space<vmem>>, vector<1x8x16xf32>
    %44 = vector.shape_cast %43 : vector<1x8x16xf32> to vector<8x16xf32>
    %45 = vector.shape_cast %42 : vector<8x16xf32> to vector<1x8x16xf32>
    tpu.vector_store %arg9[%c0_24, %c0_25, %c0_26], %45 {strides = array<i32>} : memref<1x8x16xf32, #tpu.memory_space<vmem>>, vector<1x8x16xf32>,
    %c0_27 = arith.constant 0 : index
    %c0_28 = arith.constant 0 : index
    %c0_29 = arith.constant 0 : index
    %46 = vector.load %arg10[%c0_27, %c0_28, %c0_29] : memref<1x1x16xi32, #tpu.memory_space<vmem>>, vector<1x1x16xi32>
    %47 = vector.shape_cast %46 : vector<1x1x16xi32> to vector<1x16xi32>
    %48 = vector.shape_cast %32 : vector<1x16xi32> to vector<1x1x16xi32>
    tpu.vector_store %arg10[%c0_27, %c0_28, %c0_29], %48 {strides = array<i32>} : memref<1x1x16xi32, #tpu.memory_space<vmem>>, vector<1x1x16xi32>,
    return
  }
  func.func @transform_0(%arg0: i32, %arg1: i32) -> (i32, i32, i32) {
    %c0_i32 = arith.constant 0 : i32
    %c0_i32_0 = arith.constant 0 : i32
    return %arg0, %c0_i32, %arg1 : i32, i32, i32
  }
  func.func @transform_1(%arg0: i32, %arg1: i32) -> (i32, i32) {
    %c0_i32 = arith.constant 0 : i32
    %c0_i32_0 = arith.constant 0 : i32
    %c0_i32_1 = arith.constant 0 : i32
    return %c0_i32, %c0_i32_0 : i32, i32
  }
  func.func @transform_2(%arg0: i32, %arg1: i32) -> (i32, i32) {
    %c0_i32 = arith.constant 0 : i32
    %c0_i32_0 = arith.constant 0 : i32
    %c0_i32_1 = arith.constant 0 : i32
    return %c0_i32, %c0_i32_0 : i32, i32
  }
  func.func @transform_3(%arg0: i32, %arg1: i32) -> (i32, i32, i32) {
    %c0_i32 = arith.constant 0 : i32
    %c0_i32_0 = arith.constant 0 : i32
    %c0_i32_1 = arith.constant 0 : i32
    %c0_i32_2 = arith.constant 0 : i32
    return %c0_i32, %c0_i32_0, %c0_i32_1 : i32, i32, i32
  }
  func.func @transform_4(%arg0: i32, %arg1: i32) -> (i32, i32, i32) {
    %c0_i32 = arith.constant 0 : i32
    %c0_i32_0 = arith.constant 0 : i32
    %c0_i32_1 = arith.constant 0 : i32
    %c0_i32_2 = arith.constant 0 : i32
    return %c0_i32, %c0_i32_0, %c0_i32_1 : i32, i32, i32
  }
  func.func @transform_5(%arg0: i32, %arg1: i32) -> (i32, i32) {
    %c0_i32 = arith.constant 0 : i32
    %c0_i32_0 = arith.constant 0 : i32
    %c0_i32_1 = arith.constant 0 : i32
    return %c0_i32, %c0_i32_0 : i32, i32
  }
  func.func @transform_6(%arg0: i32, %arg1: i32) -> (i32, i32, i32) {
    %c0_i32 = arith.constant 0 : i32
    %c0_i32_0 = arith.constant 0 : i32
    return %arg0, %c0_i32, %arg1 : i32, i32, i32
  }
  func.func @transform_7(%arg0: i32, %arg1: i32) -> (i32, i32, i32) {
    %c0_i32 = arith.constant 0 : i32
    %c0_i32_0 = arith.constant 0 : i32
    return %arg0, %c0_i32, %arg1 : i32, i32, i32
  }
  func.func @transform_8(%arg0: i32, %arg1: i32) -> (i32, i32, i32) {
    %c0_i32 = arith.constant 0 : i32
    %c0_i32_0 = arith.constant 0 : i32
    return %arg0, %c0_i32, %arg1 : i32, i32, i32
  }
}

module attributes {stable_mosaic.version = 11 : i64} {
  func.func @_fvq_kernel(%arg0: i32, %arg1: i32, %arg2: memref<1x32x16xf32, #tpu.memory_space<vmem>>, %arg3: memref<9x32xf32, #tpu.memory_space<vmem>>, %arg4: memref<9x1xf32, #tpu.memory_space<vmem>>, %arg5: memref<1x9x64xf32, #tpu.memory_space<vmem>>, %arg6: memref<1x32x64xf32, #tpu.memory_space<vmem>>, %arg7: memref<32x1xf32, #tpu.memory_space<vmem>>, %arg8: memref<1x32x16xf32, #tpu.memory_space<vmem>>, %arg9: memref<1x8x16xf32, #tpu.memory_space<vmem>>, %arg10: memref<1x1x16xi32, #tpu.memory_space<vmem>>) attributes {dimension_semantics = [#tpu.dimension_semantics<parallel>, #tpu.dimension_semantics<parallel>], iteration_bounds = array<i64: 2, 1>, scalar_prefetch = 0 : i64, scratch_operands = 0 : i64, tpu.core_type = #tpu.core_type<tc>, window_params = [{transform_indices = @transform_0, window_bounds = array<i64: 1, 32, 16>}, {pipeline_mode = #tpu.pipeline_mode<synchronous>, transform_indices = @transform_1, window_bounds = array<i64: 9, 32>}, {pipeline_mode = #tpu.pipeline_mode<synchronous>, transform_indices = @transform_2, window_bounds = array<i64: 9, 1>}, {pipeline_mode = #tpu.pipeline_mode<synchronous>, transform_indices = @transform_3, window_bounds = array<i64: 1, 9, 64>}, {pipeline_mode = #tpu.pipeline_mode<synchronous>, transform_indices = @transform_4, window_bounds = array<i64: 1, 32, 64>}, {pipeline_mode = #tpu.pipeline_mode<synchronous>, transform_indices = @transform_5, window_bounds = array<i64: 32, 1>}, {transform_indices = @transform_6, window_bounds = array<i64: 1, 32, 16>}, {transform_indices = @transform_7, window_bounds = array<i64: 1, 8, 16>}, {transform_indices = @transform_8, window_bounds = array<i64: 1, 1, 16>}]} {
    %c0 = arith.constant 0 : index
    %c0_0 = arith.constant 0 : index
    %c0_1 = arith.constant 0 : index
    %0 = vector.load %arg2[%c0, %c0_0, %c0_1] : memref<1x32x16xf32, #tpu.memory_space<vmem>>, vector<1x32x16xf32>
    %1 = vector.shape_cast %0 : vector<1x32x16xf32> to vector<32x16xf32>
    %c0_2 = arith.constant 0 : index
    %c0_3 = arith.constant 0 : index
    %2 = vector.load %arg3[%c0_2, %c0_3] : memref<9x32xf32, #tpu.memory_space<vmem>>, vector<9x32xf32>
    %cst = arith.constant dense<0.000000e+00> : vector<9x16xf32>
    %3 = tpu.matmul %2, %1, %cst {dimension_numbers = #tpu.dot_dimension_numbers<[1], [0], [0], [1], [0, 0, 1, 1], [], []>} : vector<9x32xf32>, vector<32x16xf32>, vector<9x16xf32> -> vector<9x16xf32>
    %c0_4 = arith.constant 0 : index
    %c0_5 = arith.constant 0 : index
    %4 = vector.load %arg4[%c0_4, %c0_5] : memref<9x1xf32, #tpu.memory_space<vmem>>, vector<9x1xf32>
    %5 = vector.broadcast %4 : vector<9x1xf32> to vector<9x16xf32>
    %6 = arith.addf %3, %5 : vector<9x16xf32>
    %7 = tpu.iota {dimensions = array<i32: 0>} : vector<64x16xi32>
    %cst_6 = arith.constant 0xFF800000 : f32
    %8 = vector.broadcast %cst_6 : f32 to vector<1x16xf32>
    %c0_i32 = arith.constant 0 : i32
    %9 = vector.broadcast %c0_i32 : i32 to vector<1x16xi32>
    %cst_7 = arith.constant 0.000000e+00 : f32
    %10 = vector.broadcast %cst_7 : f32 to vector<32x16xf32>
    %c0_8 = arith.constant 0 : index
    %c0_9 = arith.constant 0 : index
    %c0_10 = arith.constant 0 : index
    %11 = vector.load %arg5[%c0_8, %c0_9, %c0_10] : memref<1x9x64xf32, #tpu.memory_space<vmem>>, vector<1x9x64xf32>
    %12 = vector.shape_cast %11 : vector<1x9x64xf32> to vector<9x64xf32>
    %cst_11 = arith.constant dense<0.000000e+00> : vector<64x16xf32>
    %13 = tpu.matmul %12, %6, %cst_11 {dimension_numbers = #tpu.dot_dimension_numbers<[0], [0], [1], [1], [0, 1, 1, 1], [], []>} : vector<9x64xf32>, vector<9x16xf32>, vector<64x16xf32> -> vector<64x16xf32>
    %cst_12 = arith.constant dense<0xFF800000> : vector<16xf32>
    %14 = vector.multi_reduction <maximumf>, %13, %cst_12 [0] : vector<64x16xf32> to vector<16xf32>
    %15 = vector.shape_cast %14 : vector<16xf32> to vector<1x16xf32>
    %16 = vector.broadcast %15 : vector<1x16xf32> to vector<64x16xf32>
    %17 = arith.cmpf oge, %13, %16 : vector<64x16xf32>
    %c64_i32 = arith.constant 64 : i32
    %18 = vector.broadcast %c64_i32 : i32 to vector<64x16xi32>
    %19 = arith.select %17, %7, %18 : vector<64x16xi1>, vector<64x16xi32>
    %cst_13 = arith.constant dense<2147483647> : vector<16xi32>
    %20 = vector.multi_reduction <minsi>, %19, %cst_13 [0] : vector<64x16xi32> to vector<16xi32>
    %21 = vector.shape_cast %20 : vector<16xi32> to vector<1x16xi32>
    %22 = vector.broadcast %21 : vector<1x16xi32> to vector<64x16xi32>
    %23 = arith.cmpi eq, %7, %22 : vector<64x16xi32>
    %24 = arith.extui %23 : vector<64x16xi1> to vector<64x16xi32>
    %25 = arith.sitofp %24 : vector<64x16xi32> to vector<64x16xf32>
    %c0_14 = arith.constant 0 : index
    %c0_15 = arith.constant 0 : index
    %c0_16 = arith.constant 0 : index
    %26 = vector.load %arg6[%c0_14, %c0_15, %c0_16] : memref<1x32x64xf32, #tpu.memory_space<vmem>>, vector<1x32x64xf32>
    %27 = vector.shape_cast %26 : vector<1x32x64xf32> to vector<32x64xf32>
    %cst_17 = arith.constant dense<0.000000e+00> : vector<32x16xf32>
    %28 = tpu.matmul %27, %25, %cst_17 {dimension_numbers = #tpu.dot_dimension_numbers<[1], [0], [0], [1], [0, 0, 1, 1], [], []>} : vector<32x64xf32>, vector<64x16xf32>, vector<32x16xf32> -> vector<32x16xf32>
    %29 = arith.cmpf ogt, %15, %8 : vector<1x16xf32>
    %c0_i32_18 = arith.constant 0 : i32
    %30 = vector.broadcast %c0_i32_18 : i32 to vector<1x16xi32>
    %31 = arith.addi %30, %21 : vector<1x16xi32>
    %32 = arith.select %29, %31, %9 : vector<1x16xi1>, vector<1x16xi32>
    %33 = vector.shape_cast %29 : vector<1x16xi1> to vector<1x16xi1>
    %34 = vector.broadcast %33 : vector<1x16xi1> to vector<32x16xi1>
    %35 = arith.select %34, %28, %10 : vector<32x16xi1>, vector<32x16xf32>
    %c0_19 = arith.constant 0 : index
    %c0_20 = arith.constant 0 : index
    %36 = vector.load %arg7[%c0_19, %c0_20] : memref<32x1xf32, #tpu.memory_space<vmem>>, vector<32x1xf32>
    %37 = vector.broadcast %36 : vector<32x1xf32> to vector<32x16xf32>
    %38 = arith.addf %35, %37 : vector<32x16xf32>
    %c0_21 = arith.constant 0 : index
    %c0_22 = arith.constant 0 : index
    %c0_23 = arith.constant 0 : index
    %39 = vector.load %arg8[%c0_21, %c0_22, %c0_23] : memref<1x32x16xf32, #tpu.memory_space<vmem>>, vector<1x32x16xf32>
    %40 = vector.shape_cast %39 : vector<1x32x16xf32> to vector<32x16xf32>
    %41 = vector.shape_cast %38 : vector<32x16xf32> to vector<1x32x16xf32>
    tpu.vector_store %arg8[%c0_21, %c0_22, %c0_23], %41 {strides = array<i32>} : memref<1x32x16xf32, #tpu.memory_space<vmem>>, vector<1x32x16xf32>,
    %42 = vector.extract_strided_slice %6 {offsets = [0, 0], sizes = [8, 16], strides = [1, 1]} : vector<9x16xf32> to vector<8x16xf32>
    %c0_24 = arith.constant 0 : index
    %c0_25 = arith.constant 0 : index
    %c0_26 = arith.constant 0 : index
    %43 = vector.load %arg9[%c0_24, %c0_25, %c0_26] : memref<1x8x16xf32, #tpu.memory_space<vmem>>, vector<1x8x16xf32>
    %44 = vector.shape_cast %43 : vector<1x8x16xf32> to vector<8x16xf32>
    %45 = vector.shape_cast %42 : vector<8x16xf32> to vector<1x8x16xf32>
    tpu.vector_store %arg9[%c0_24, %c0_25, %c0_26], %45 {strides = array<i32>} : memref<1x8x16xf32, #tpu.memory_space<vmem>>, vector<1x8x16xf32>,
    %c0_27 = arith.constant 0 : index
    %c0_28 = arith.constant 0 : index
    %c0_29 = arith.constant 0 : index
    %46 = vector.load %arg10[%c0_27, %c0_28, %c0_29] : memref<1x1x16xi32, #tpu.memory_space<vmem>>, vector<1x1x16xi32>
    %47 = vector.shape_cast %46 : vector<1x1x16xi32> to vector<1x16xi32>
    %48 = vector.shape_cast %32 : vector<1x16xi32> to vector<1x1x16xi32>
    tpu.vector_store %arg10[%c0_27, %c0_28, %c0_29], %48 {strides = array<i32>} : memref<1x1x16xi32, #tpu.memory_space<vmem>>, vector<1x1x16xi32>,
    return
  }
  func.func @transform_0(%arg0: i32, %arg1: i32) -> (i32, i32, i32) {
    %c0_i32 = arith.constant 0 : i32
    %c0_i32_0 = arith.constant 0 : i32
    return %arg0, %c0_i32, %arg1 : i32, i32, i32
  }
  func.func @transform_1(%arg0: i32, %arg1: i32) -> (i32, i32) {
    %c0_i32 = arith.constant 0 : i32
    %c0_i32_0 = arith.constant 0 : i32
    %c0_i32_1 = arith.constant 0 : i32
    return %c0_i32, %c0_i32_0 : i32, i32
  }
  func.func @transform_2(%arg0: i32, %arg1: i32) -> (i32, i32) {
    %c0_i32 = arith.constant 0 : i32
    %c0_i32_0 = arith.constant 0 : i32
    %c0_i32_1 = arith.constant 0 : i32
    return %c0_i32, %c0_i32_0 : i32, i32
  }
  func.func @transform_3(%arg0: i32, %arg1: i32) -> (i32, i32, i32) {
    %c0_i32 = arith.constant 0 : i32
    %c0_i32_0 = arith.constant 0 : i32
    %c0_i32_1 = arith.constant 0 : i32
    %c0_i32_2 = arith.constant 0 : i32
    return %c0_i32, %c0_i32_0, %c0_i32_1 : i32, i32, i32
  }
  func.func @transform_4(%arg0: i32, %arg1: i32) -> (i32, i32, i32) {
    %c0_i32 = arith.constant 0 : i32
    %c0_i32_0 = arith.constant 0 : i32
    %c0_i32_1 = arith.constant 0 : i32
    %c0_i32_2 = arith.constant 0 : i32
    return %c0_i32, %c0_i32_0, %c0_i32_1 : i32, i32, i32
  }
  func.func @transform_5(%arg0: i32, %arg1: i32) -> (i32, i32) {
    %c0_i32 = arith.constant 0 : i32
    %c0_i32_0 = arith.constant 0 : i32
    %c0_i32_1 = arith.constant 0 : i32
    return %c0_i32, %c0_i32_0 : i32, i32
  }
  func.func @transform_6(%arg0: i32, %arg1: i32) -> (i32, i32, i32) {
    %c0_i32 = arith.constant 0 : i32
    %c0_i32_0 = arith.constant 0 : i32
    return %arg0, %c0_i32, %arg1 : i32, i32, i32
  }
  func.func @transform_7(%arg0: i32, %arg1: i32) -> (i32, i32, i32) {
    %c0_i32 = arith.constant 0 : i32
    %c0_i32_0 = arith.constant 0 : i32
    return %arg0, %c0_i32, %arg1 : i32, i32, i32
  }
  func.func @transform_8(%arg0: i32, %arg1: i32) -> (i32, i32, i32) {
    %c0_i32 = arith.constant 0 : i32
    %c0_i32_0 = arith.constant 0 : i32
    return %arg0, %c0_i32, %arg1 : i32, i32, i32
  }
}

</mosaic_0001>

<bundles_post_ra>
// kernel: tpu_custom_call.1
= control target key start
LH: loop header
LB: loop body
LE: loop exit
PB: predicated region body
PF: predicated region fallthrough
CT: control target
= control target key end

     0   :  { %s1728_s0 = inlined_call_operand.vmem [shape: f32[2,32,16], index: 0, kind: input, shape index: {}]   ;;  %s1729_s1 = inlined_call_operand.vmem [shape: f32[9,32], index: 1, kind: input, shape index: {}]   ;;  %s1730_s2 = inlined_call_operand.vmem [shape: f32[9,1], index: 2, kind: input, shape index: {}]   ;;  %s1731_s3 = inlined_call_operand.vmem [shape: f32[1,9,64], index: 3, kind: input, shape index: {}]   ;;  %s1732_s4 = inlined_call_operand.vmem [shape: f32[1,32,64], index: 4, kind: input, shape index: {}]   ;;  %s1733_s5 = inlined_call_operand.vmem [shape: f32[32,1], index: 5, kind: input, shape index: {}]   ;;  %s1734_s6 = inlined_call_operand.vmem [shape: f32[2,32,16], index: 6, kind: output, shape index: {0}]   ;;  %s1735_s7 = inlined_call_operand.hbm [shape: f32[2,8,16], index: 7, kind: output, shape index: {1}]   ;;  %s1736_s8 = inlined_call_operand.hbm [shape: s32[2,1,16], index: 8, kind: output, shape index: {2}]  }
   0x1   :  { %1739 = sst [smem:[#allocation8_spill]] %s1728_s0 }
   0x2   :  { %1740 = sst [smem:[#allocation9_spill]] %s1729_s1 }
   0x3   :  { %1741 = sst [smem:[#allocation10_spill]] %s1730_s2 }
   0x4   :  { %1742 = sst [smem:[#allocation11_spill]] %s1731_s3 }
   0x5   :  { %14 = vsyncpa [#allocation3], 0 }
   0x6   :  { %16 = vsyncpa [#allocation3 + $0x1], 0 }
   0x7   :  { %17 = vsyncpa [#allocation5], 0 }
   0x8   :  { %19 = vsyncpa [#allocation5 + $0x1], 0  ;;  %s1442_s27 = smov 0   ;;  %s1444_s28 = smov 0  }
   0x9   :  { %s1446_s29 = smov 0   ;;  %s1448_s30 = smov 0  }
   0xa   :  { %s1450_s9 = smov 0   ;;  %s1452_s10 = smov 0  }
   0xb LB: > { %s1059_s11 = sadd.s32 4294967295, %s1390_s10   ;;  %s1060_s12 = sadd.s32 4294967294, %s1390_s10   ;;  %s1390_s10 = sphi %s1452_s10, %s25_s10   ;;  %s1386_s9 = sphi %s1450_s9, %s1755_s9   ;;  %s1382_s30 = sphi %s1448_s30, %s1754_s30   ;;  %s1378_s29 = sphi %s1446_s29, %s1753_s29   ;;  %s1374_s28 = sphi %s1444_s28, %s1752_s28   ;;  %s1370_s27 = sphi %s1442_s27, %s1751_s27  }
   0xc   : > { %s37_s13 = sadd.s32 1, %s1386_s9  ;;  %s207_s14 = sadd.s32 1, %s1378_s29 }
   0xd   : > { %p39_p0 = scmp.ge.s32.totalorder %s37_s13, 2  ;;  %p217_p1 = scmp.ne.s32.totalorder %s1378_s29, %s1374_s28 }
   0xe   : > { %p218_p2 = scmp.eq.s32.totalorder %s1059_s11, 1  ;;  %p223_p3 = scmp.ne.s32.totalorder %s1374_s28, %s1370_s27 }
   0xf   : > { %s1757_s13 = smov (%p39_p0, %s37_s13), 0  ;;  %p224_p5 = scmp.eq.s32.totalorder %s1060_s12, 1 }
  0x10   : > { %p1482_p4 = por %p218_p2, %p217_p1  ;;  %s202_s16 = ssub.s32 %s1386_s9, %s1757_s13 }
  0x11   : > { %p1063_p6 = scmp.ge.s32.totalorder %s1390_s10, 1  ;;  %p205_p7 = scmp.eq.s32.totalorder %s202_s16, 0 }
  0x12   : > { %p1489_p8 = por %p224_p5, %p223_p3  ;;  %p296_p9 = scmp.lt.s32.totalorder %s1390_s10, 3 }
  0x13   : > { %s1495_s18 = scalar_select %p205_p7, %s1378_s29, %s207_s14  }
  0x14   : > { %p297_p10 = pnand %p1063_p6, %p296_p9 }
  0x15   : > { %p345_p11 = scmp.lt.s32.totalorder (!%p297_p10), %s1382_s30, 1  ;;  %s1745_s1 = sld [smem:[#allocation9_spill]] (!%p297_p10)  ;;  %vm379_vm0 = vcmask (!%p297_p10), 261120   ;;  %v1392_v1 = vmov (!%p297_p10), 0   ;;  %v841_v11 = vld [vmem:[%s1733_s5] sm:$0xff] (!%p297_p10)  ;;  %v843_v13 = vld [vmem:[%s1733_s5 + $0x10] sm:$0xff] (!%p297_p10)  ;;  %v461_v57 = vlaneseq (!%p297_p10) }
  0x16   : > { %300 = sbr.rel (%p297_p10) target bundleno = 774 (0x306), region = 44  ;;  %1278 = vset.pattern.permute.xlu0 (!%p297_p10), %v1392_v1  ;;  %s1746_s2 = sld [smem:[#allocation10_spill]] (!%p297_p10)  ;;  %v844_v15 = vld [vmem:[%s1733_s5 + $0x18] sm:$0xff] (!%p297_p10)  ;;  %vm504_vm1 = vcmask (!%p297_p10), 72704   ;;  %vm529_vm2 = vcmask (!%p297_p10), 1040384   ;;  %vm638_vm3 = vcmask (!%p297_p10), 130048  }
  0x17   : > { %s1747_s3 = sld [smem:[#allocation11_spill]] (!%p297_p10)  ;;  %s1748_s0 = sld [smem:[#allocation8_spill]] (!%p297_p10)  ;;  %vm1393_vm4 = vmmov (!%p297_p10), 1   ;;  %v731_v31 = vld [vmem:[%s1732_s4] sm:$0xff] (!%p297_p10)  ;;  %vm735_vm6 = vcmask (!%p297_p10), 523264   ;;  %v842_v32 = vld [vmem:[%s1733_s5 + $0x8] sm:$0xff] (!%p297_p10) }
  0x18   : > { %s1538_s20 = sand.u32 (!%p297_p10), 1, %s1374_s28   ;;  %vm1193_vm5 = vmpackc.low (!%p297_p10), %vm529_vm2, %vm1393_vm4  ;;  %v1567_v60 = vshrl.u32 (!%p297_p10), %v461_v57, 7  ;;  %s1101_s11 = sshll.u32 (!%p297_p10), %s1382_s30, 7 }
  0x19   : > { %s1738_s14 = scalar_lea.vmem (!%p297_p10), [#allocation4], %s1538_s20  ;;  %s1642_s16 = scalar_lea.hbm (!%p297_p10), %s1735_s7, %s1101_s11 }
  0x1a   : > { %v1570_v63 = vadd.s32 (!%p297_p10), 16, %v1567_v60 }
  0x1b   : > { %v365_v0 = vld [vmem:[%s1745_s1] sm:$0xff] (!%p297_p10)  ;;  %v366_v14 = vld [vmem:[%s1745_s1 + $0x8] sm:$0x1] (!%p297_p10) }
  0x1c   : > { %1143 = vmatprep.mubr.msk.f32.mxu0 (!%p297_p10), %vm379_vm0, %v365_v0  ;;  %v367_v2 = vld [vmem:[%s1746_s2] sm:$0xff] (!%p297_p10)  ;;  %v368_v4 = vld [vmem:[%s1746_s2 + $0x8] sm:$0x1] (!%p297_p10)  ;;  %v1573_v0 = vadd.s32 (!%p297_p10), 24, %v1567_v60 }
  0x1d   : > { %s1506_s23 = scalar_select %p345_p11, %s1382_s30, 1  ;;  %371 = vperm.xlu0 %1278, %v367_v2   ;;  %v470_v3 = vld [vmem:[%s1747_s3] sm:$0xff]  ;;  %v471_v5 = vld [vmem:[%s1747_s3 + $0x8] sm:$0x1]  ;;  %v1579_v2 = vadd.s32 56, %v1567_v60 }
  0x1e   : > { %472 = vxpose.xlu1.b32.start [1/2] (short) (narrow) %v470_v3, 64 }
  0x1f   : > { %s1737_s12 = sshll.u32 %s1506_s23, 5 }
  0x20   : > { %s352_s21 = scalar_lea.vmem %s1748_s0, %s1737_s12  ;;  %s1395_s0 = smov [#allocation2]  }
  0x21   : > { %v361_v6 = vld [vmem:[%s352_s21] sm:$0xff]  ;;  %v362_v7 = vld [vmem:[%s352_s21 + $0x8] sm:$0xff]  ;;  %v363_v8 = vld [vmem:[%s352_s21 + $0x10] sm:$0xff]  ;;  %376 = vperm.xlu0 %1278, %v368_v4   ;;  %v463_v4 = vadd.s32 8, %v1567_v60  ;;  %s1284_s1 = sshll.u32 %s1395_s0, 4  ;;  %s1285_s1 = int_to_ptr.vmem [resolvable:$false] %s1284_s1 }
  0x22   : > { %v1184_v9 = vpack.c.bf16 %v362_v7, %v361_v6  ;;  %v364_v10 = vld [vmem:[%s352_s21 + $0x18] sm:$0xff]  ;;  %473 = vxpose.xlu1.b32.end [2/2] (short) (narrow) %v471_v5, 64  ;;  %s1064_s21 = sshll.u32 %s1538_s20, 3  ;;  %v1585_v5 = vadd.s32 32, %v1567_v60  ;;  %v1588_v6 = vadd.s32 40, %v1567_v60  ;;  %s1286_s25 = scalar_lea.vmem %s1285_s1, 256 }
  0x23   : > { %v1188_v12 = vpack.c.bf16 %v364_v10, %v363_v8  ;;  %s1541_s22 = scalar_lea.vmem [#allocation2], %s1064_s21  ;;  %s885_s21 = scalar_lea.sflag [#allocation3], %s1538_s20 }
  0x24   : > { %1185 = vmatprep.subr.bf16.mxu0 %v1184_v9  ;;  %s906_s19 = sshll.u32 %s1541_s22, 4  ;;  %s907_s19 = int_to_ptr.vmem [resolvable:$true] %s906_s19 }
  0x25   : > { %1187 = vmatpush3.bf16.msra.mxu0 %v1184_v9  ;;  %847 = vperm.xlu0 %1278, %v841_v11   ;;  %s1280_s24 = scalar_lea.vmem %s907_s19, 128  ;;  %p1287_p1 = scmp.lt.s32.totalorder %s907_s19, %s1285_s1 }
  0x26   : > { %1189 = vmatprep.subr.bf16.mxu0 %v1188_v12  ;;  %p1281_p12 = scmp.ne.s32.totalorder %s907_s19, %s1280_s24  ;;  %p1288_p2 = scmp.lt.s32.totalorder %s1286_s25, %s1280_s24 }
  0x28   : > { %p1282_p13 = pnand %p1281_p12, %p1482_p4  ;;  %p1289_p3 = por %p1288_p2, %p1287_p1 }
  0x29   : > { %1191 = vmatpush3.bf16.msra.mxu0 %v1188_v12  ;;  %857 = vperm.xlu0 %1278, %v843_v13  }
  0x2a   : > { %p1283_p0 = pneg %p1282_p13 }
  0x2c   : > { %1144 = vmatmul.mubr.msk.f32.vlgmr.msra.gmra.mrb[0].mxu0 %vm379_vm0, %v366_v14  ;;  %p1290_p5 = pnand %p1289_p3, %p1283_p0 }
  0x2d   : > { %862 = vperm.xlu0 %1278, %v844_v15  }
  0x40   : > { %1279 = vset.pattern.permute.xlu1 %v1392_v1  ;;  %v1576_v1 = vadd.s32 48, %v1567_v60 }
  0x58   : > { %852 = vperm.xlu1 %1279, %v842_v32  }
  0x9c   : > { %v372_v19 = vpop.permute.xlu0 %371 }
  0x9e   : > { %v488_v16 = vpop.trf.xlu1 }
  0x9f   : > { %1150 = vmatprep.mubr.msk.f32.mxu1 %vm504_vm1, %v488_v16 }
  0xa0   : > { %v377_v21 = vpop.permute.xlu0 %376 }
  0xa2   : > { %v489_v17 = vpop.trf.xlu1 }
  0xa6   : > { %v490_v18 = vpop.trf.xlu1 }
  0xaa   : > { %v491_v20 = vpop.trf.xlu1 }
  0xae   : > { %v492_v25 = vpop.trf.xlu1 }
  0xb2   : > { %v493_v28 = vpop.trf.xlu1 }
  0xb6   : > { %v494_v29 = vpop.trf.xlu1 }
  0xba   : > { %v495_v30 = vpop.trf.xlu1 }
  0xff   : > { %v1145_v22 = vpop.f32.mrb[0].mxu0 }
 0x100   : > { %v458_v23 = vadd.f32 %v1145_v22, %v377_v21  ;;  %v452_v24 = vpop.f32.mrb[1].mxu0 }
 0x101   : > { %v453_v26 = vadd.f32 %v452_v24, %v372_v19 }
 0x103   : > { %v1192_v27 = vpack.c.bf16 %v458_v23, %v453_v26  ;;  %873 = vst.msk [vmem:[%s1541_s22] sm:$0xff] %vm638_vm3, %v453_v26 }
 0x105   : > { %1194 = vmatprep.subr.msk.bf16.mxu1 %vm1193_vm5, %v1192_v27 }
 0x106   : > { %1197 = vmatpush3.bf16.msk.msra.mxu1 %vm1193_vm5, %v1192_v27 }
 0x109   : > { %1151 = vmatmul.mubr.msk.f32.vlgmr.msra.gmra.mrb[0].mxu1 %vm504_vm1, %v489_v17 }
 0x10a   : > { %1153 = vmatprep.mubr.msk.f32.mxu1 %vm504_vm1, %v490_v18 }
 0x10d   : > { %1154 = vmatmul.mubr.msk.f32.gmra.mrb[2].mxu1 %vm504_vm1, %v491_v20 }
 0x10e   : > { %1156 = vmatprep.mubr.msk.f32.mxu1 %vm504_vm1, %v492_v25 }
 0x111   : > { %1157 = vmatmul.mubr.msk.f32.gmra.mrb[4].mxu1 %vm504_vm1, %v493_v28 }
 0x112   : > { %1159 = vmatprep.mubr.msk.f32.mxu1 %vm504_vm1, %v494_v29 }
 0x115   : > { %1160 = vmatmul.mubr.msk.f32.gmra.mrb[6].mxu1 %vm504_vm1, %v495_v30 }
 0x116   : > { %1178 = vmatprep.mubr.msk.f32.mxu1 %vm735_vm6, %v731_v31 }
 0x1dc   : > { %v1152_v33 = vpop.f32.mrb[0].mxu1 }
 0x1dd   : > { %v599_v34 = vpop.f32.mrb[1].mxu1  ;;  %v640_v38 = vsel %vm638_vm3, %v1152_v33, -inf }
 0x1de   : > { %v639_v41 = vsel %vm638_vm3, %v599_v34, -inf }
 0x1e0   : > { %v1155_v35 = vpop.f32.mrb[2].mxu1 }
 0x1e1   : > { %v609_v36 = vpop.f32.mrb[3].mxu1  ;;  %v642_v46 = vsel %vm638_vm3, %v1155_v35, -inf }
 0x1e2   : > { %v641_v50 = vsel %vm638_vm3, %v609_v36, -inf }
 0x1e4   : > { %v1158_v37 = vpop.f32.mrb[4].mxu1 }
 0x1e5   : > { %v645_v39 = vsel %vm638_vm3, %v1158_v37, -inf  ;;  %v619_v40 = vpop.f32.mrb[5].mxu1 }
 0x1e6   : > { %v646_v42 = vmax.f32 %v640_v38, %v645_v39  ;;  %v643_v43 = vsel %vm638_vm3, %v619_v40, -inf  ;;  %v732_v38 = vld [vmem:[%s1732_s4 + $0x8] sm:$0xff]  ;;  %v733_v39 = vld [vmem:[%s1732_s4 + $0x10] sm:$0xff] }
 0x1e7   : > { %v644_v44 = vmax.f32 %v639_v41, %v643_v43 }
 0x1e8   : > { %v1161_v45 = vpop.f32.mrb[6].mxu1 }
 0x1e9   : > { %v651_v47 = vmax.f32 %v644_v44, %v646_v42  ;;  %v649_v48 = vsel %vm638_vm3, %v1161_v45, -inf  ;;  %v629_v49 = vpop.f32.mrb[7].mxu1 }
 0x1ea   : > { %v650_v51 = vmax.f32 %v642_v46, %v649_v48  ;;  %v647_v52 = vsel %vm638_vm3, %v629_v49, -inf }
 0x1eb   : > { %v648_v53 = vmax.f32 %v641_v50, %v647_v52 }
 0x1ed   : > { %v652_v54 = vmax.f32 %v648_v53, %v650_v51 }
 0x1ef   : > { %v653_v55 = vmax.f32 %v651_v47, %v652_v54 }
 0x1f1   : > { %v654_v56 = vrot.slane %v653_v55, 4 }
 0x1f3   : > { %v655_v58 = vmax.f32 %v653_v55, %v654_v56 }
 0x1f5   : > { %v656_v59 = vrot.slane %v655_v58, 2 }
 0x1f7   : > { %v657_v61 = vmax.f32 %v655_v58, %v656_v59 }
 0x1f9   : > { %v658_v62 = vrot.slane %v657_v61, 1 }
 0x1fb   : > { %v1581_v3 = vmax.f32 %v657_v61, %v658_v62 }
 0x1fd   : > { %vm662_vm7 = vcmp.ge.f32.partialorder %v609_v36, %v1581_v3  ;;  %vm663_vm8 = vcmp.ge.f32.partialorder %v1155_v35, %v1581_v3  ;;  %vm666_vm9 = vcmp.ge.f32.partialorder %v629_v49, %v1581_v3  ;;  %vm667_vm10 = vcmp.ge.f32.partialorder %v1161_v45, %v1581_v3 }
 0x1fe   : > { %v670_v7 = vsel %vm662_vm7, %v1570_v63, 64  ;;  %v671_v8 = vsel %vm663_vm8, %v1573_v0, 64  ;;  %v674_v9 = vsel %vm666_vm9, %v1576_v1, 64  ;;  %v675_v10 = vsel %vm667_vm10, %v1579_v2, 64 }
 0x1ff   : > { %v678_v11 = vsel %vm638_vm3, %v670_v7, 2147483647  ;;  %v679_v12 = vsel %vm638_vm3, %v671_v8, 2147483647  ;;  %v686_v13 = vsel %vm638_vm3, %v674_v9, 2147483647  ;;  %vm660_vm11 = vcmp.ge.f32.partialorder %v599_v34, %v1581_v3 }
 0x200   : > { %vm687_vm12 = vcmp.lt.s32.totalorder %v678_v11, %v686_v13  ;;  %v689_v14 = vsel %vm638_vm3, %v675_v10, 2147483647  ;;  %vm661_vm13 = vcmp.ge.f32.partialorder %v1152_v33, %v1581_v3  ;;  %vm664_vm14 = vcmp.ge.f32.partialorder %v619_v40, %v1581_v3  ;;  %v734_v40 = vld [vmem:[%s1732_s4 + $0x18] sm:$0xff] }
 0x201   : > { %v688_v15 = vsel %vm687_vm12, %v678_v11, %v686_v13  ;;  %vm690_vm15 = vcmp.lt.s32.totalorder %v679_v12, %v689_v14  ;;  %vm665_vm0 = vcmp.ge.f32.partialorder %v1158_v37, %v1581_v3  ;;  %v668_v16 = vsel %vm660_vm11, %v1567_v60, 64 }
 0x202   : > { %v691_v17 = vsel %vm690_vm15, %v679_v12, %v689_v14  ;;  %v669_v18 = vsel %vm661_vm13, %v463_v4, 64  ;;  %v672_v19 = vsel %vm664_vm14, %v1585_v5, 64  ;;  %v673_v20 = vsel %vm665_vm0, %v1588_v6, 64 }
 0x203   : > { %vm694_vm1 = vcmp.lt.s32.totalorder %v688_v15, %v691_v17  ;;  %v676_v21 = vsel %vm638_vm3, %v668_v16, 2147483647  ;;  %v677_v22 = vsel %vm638_vm3, %v669_v18, 2147483647  ;;  %v680_v23 = vsel %vm638_vm3, %v672_v19, 2147483647 }
 0x204   : > { %v695_v24 = vsel %vm694_vm1, %v688_v15, %v691_v17  ;;  %vm681_vm2 = vcmp.lt.s32.totalorder %v676_v21, %v680_v23  ;;  %v683_v25 = vsel %vm638_vm3, %v673_v20, 2147483647  ;;  %vm874_vm11 = vcmask 122880  }
 0x205   : > { %v682_v26 = vsel %vm681_vm2, %v676_v21, %v680_v23  ;;  %vm684_vm4 = vcmp.lt.s32.totalorder %v677_v22, %v683_v25  ;;  %vm833_vm1 = vcmp.gt.f32.partialorder %v1581_v3, -inf  ;;  %v1394_v36 = vmov 1.0|1.0  }
 0x206   : > { %v685_v27 = vsel %vm684_vm4, %v677_v22, %v683_v25 }
 0x207   : > { %vm692_vm5 = vcmp.lt.s32.totalorder %v682_v26, %v685_v27 }
 0x208   : > { %v693_v28 = vsel %vm692_vm5, %v682_v26, %v685_v27 }
 0x209   : > { %vm696_vm7 = vcmp.lt.s32.totalorder %v693_v28, %v695_v24 }
 0x20a   : > { %v697_v29 = vsel %vm696_vm7, %v693_v28, %v695_v24 }
 0x20b   : > { %v698_v30 = vrot.slane %v697_v29, 4 }
 0x20d   : > { %vm699_vm8 = vcmp.lt.s32.totalorder %v697_v29, %v698_v30 }
 0x20e   : > { %v700_v31 = vsel %vm699_vm8, %v697_v29, %v698_v30 }
 0x20f   : > { %v701_v32 = vrot.slane %v700_v31, 2 }
 0x211   : > { %vm702_vm9 = vcmp.lt.s32.totalorder %v700_v31, %v701_v32 }
 0x212   : > { %v703_v33 = vsel %vm702_vm9, %v700_v31, %v701_v32 }
 0x213   : > { %v704_v34 = vrot.slane %v703_v33, 1 }
 0x215   : > { %vm705_vm10 = vcmp.lt.s32.totalorder %v703_v33, %v704_v34 }
 0x216   : > { %v706_v35 = vsel %vm705_vm10, %v703_v33, %v704_v34 }
 0x217   : > { %vm707_vm12 = vcmp.eq.s32.totalorder %v1567_v60, %v706_v35  ;;  %vm708_vm13 = vcmp.eq.s32.totalorder %v463_v4, %v706_v35  ;;  %vm709_vm14 = vcmp.eq.s32.totalorder %v1570_v63, %v706_v35  ;;  %vm710_vm15 = vcmp.eq.s32.totalorder %v1573_v0, %v706_v35 }
 0x218   : > { %vm1198_vm0 = vmpackc.low %vm708_vm13, %vm707_vm12  ;;  %v834_v37 = vsel %vm833_vm1, %v706_v35, 0  ;;  %vm711_vm4 = vcmp.eq.s32.totalorder %v1585_v5, %v706_v35  ;;  %vm712_vm5 = vcmp.eq.s32.totalorder %v1588_v6, %v706_v35  ;;  %vm713_vm8 = vcmp.eq.s32.totalorder %v1576_v1, %v706_v35 }
 0x219   : > { %1199 = vmatprep.subr.msk.bf16.mxu1 %vm1198_vm0, %v1394_v36  ;;  %vm1202_vm2 = vmpackc.low %vm710_vm15, %vm709_vm14  ;;  %875 = vst.msk [vmem:[%s1738_s14] sm:$0x1] %vm874_vm11, %v834_v37  ;;  %vm714_vm9 = vcmp.eq.s32.totalorder %v1579_v2, %v706_v35 }
 0x21a   : > { %1201 = vmatpush3.bf16.msk.msra.mxu1 %vm1198_vm0, %v1394_v36  ;;  %vm1206_vm7 = vmpackc.low %vm712_vm5, %vm711_vm4 }
 0x21b   : > { %1203 = vmatprep.subr.msk.bf16.mxu1 %vm1202_vm2, %v1394_v36  ;;  %vm1210_vm10 = vmpackc.low %vm714_vm9, %vm713_vm8 }
 0x21e   : > { %1205 = vmatpush3.bf16.msk.msra.mxu1 %vm1202_vm2, %v1394_v36 }
 0x21f   : > { %1207 = vmatprep.subr.msk.bf16.mxu1 %vm1206_vm7, %v1394_v36 }
 0x222   : > { %1209 = vmatpush3.bf16.msk.msra.mxu1 %vm1206_vm7, %v1394_v36 }
 0x223   : > { %1211 = vmatprep.subr.msk.bf16.mxu1 %vm1210_vm10, %v1394_v36 }
 0x226   : > { %1213 = vmatpush3.bf16.msk.msra.mxu1 %vm1210_vm10, %v1394_v36 }
 0x229   : > { %1179 = vmatmul.mubr.msk.f32.vlgmr.msra.gmra.mrb[8].mxu1 %vm735_vm6, %v732_v38 }
 0x22a   : > { %1181 = vmatprep.mubr.msk.f32.mxu1 %vm735_vm6, %v733_v39 }
 0x22d   : > { %1182 = vmatmul.mubr.msk.f32.gmra.mrb[10].mxu1 %vm735_vm6, %v734_v40 }
 0x22e   : > { %1293 = shalt.err (!%p1290_p5)
}
 0x22f   : > { %s1294_s12 = scalar_lea.hbm %s1642_s16, 128  ;;  %s1298_s0 = scalar_lea.hbm %s1735_s7, 256 }
 0x230   : > { %p1295_p6 = scmp.ne.s32.totalorder %s1642_s16, %s1294_s12  ;;  %p1299_p10 = scmp.lt.u32.totalorder %s1642_s16, %s1735_s7 }
 0x231   : > { %p1300_p11 = scmp.lt.u32.totalorder %s1298_s0, %s1294_s12  ;;  %p1302_p13 = scmp.lt.u32.totalorder %s1294_s12, %s1642_s16 }
 0x232   : > { %p1296_p7 = pnand %p1295_p6, %p1482_p4 }
 0x233   : > { %p1301_p12 = por %p1300_p11, %p1299_p10 }
 0x234   : > { %p1297_p9 = pneg %p1296_p7 }
 0x235   : > { %p1303_p0 = por %p1302_p13, %p1301_p12 }
 0x237   : > { %p1304_p1 = pnand %p1303_p0, %p1297_p9 }
 0x239   : > { %1307 = shalt.err (!%p1304_p1)
}
 0x23a   : > { %1214 = dma.vmem_to_hbm [thread:$0]  (%p1482_p4), %s907_s19, 128, %s1642_s16, %s885_s21  }
 0x23b   : > { %s1102_s11 = sshll.u32 %s1382_s30, 4  ;;  %s1749_s24 = scalar_lea.vmem [#allocation4], %s1538_s20 }
 0x23c   : > { %s920_s25 = sshll.u32 %s1749_s24, 4  ;;  %s1669_s0 = scalar_lea.hbm %s1736_s8, %s1102_s11  ;;  %s921_s25 = int_to_ptr.vmem [resolvable:$true] %s920_s25 }
 0x23d   : > { %s890_s12 = scalar_lea.sflag [#allocation5], %s1538_s20  ;;  %s1308_s26 = scalar_lea.vmem %s921_s25, 16 }
 0x23e   : > { %p1309_p2 = scmp.ne.s32.totalorder %s921_s25, %s1308_s26  ;;  %s1396_s1 = smov [#allocation4]  }
 0x23f   : > { %s1312_s2 = sshll.u32 %s1396_s1, 4  ;;  %s1313_s2 = int_to_ptr.vmem [resolvable:$false] %s1312_s2 }
 0x240   : > { %p1310_p3 = pnand %p1309_p2, %p1482_p4  ;;  %s1314_s3 = scalar_lea.vmem %s1313_s2, 32 }
 0x241   : > { %p1315_p6 = scmp.lt.s32.totalorder %s921_s25, %s1313_s2  ;;  %p1316_p7 = scmp.lt.s32.totalorder %s1314_s3, %s1308_s26 }
 0x242   : > { %p1311_p5 = pneg %p1310_p3 }
 0x243   : > { %p1317_p9 = por %p1316_p7, %p1315_p6 }
 0x245   : > { %p1318_p10 = pnand %p1317_p9, %p1311_p5 }
 0x247   : > { %1321 = shalt.err (!%p1318_p10)
}
 0x248   : > { %s1322_s30 = scalar_lea.hbm %s1669_s0, 16  ;;  %s1326_s19 = scalar_lea.hbm %s1736_s8, 32 }
 0x249   : > { %p1323_p11 = scmp.ne.s32.totalorder %s1669_s0, %s1322_s30  ;;  %p1327_p0 = scmp.lt.u32.totalorder %s1669_s0, %s1736_s8 }
 0x24a   : > { %p1328_p1 = scmp.lt.u32.totalorder %s1326_s19, %s1322_s30  ;;  %p1330_p3 = scmp.lt.u32.totalorder %s1322_s30, %s1669_s0 }
 0x24b   : > { %p1324_p12 = pnand %p1323_p11, %p1482_p4 }
 0x24c   : > { %p1329_p2 = por %p1328_p1, %p1327_p0 }
 0x24d   : > { %p1325_p13 = pneg %p1324_p12 }
 0x24e   : > { %p1331_p5 = por %p1330_p3, %p1329_p2 }
 0x250   : > { %p1332_p6 = pnand %p1331_p5, %p1325_p13 }
 0x252   : > { %1335 = shalt.err (!%p1332_p6)
}
 0x253   : > { %1215 = dma.vmem_to_hbm [thread:$0]  (%p1482_p4), %s921_s25, 16, %s1669_s0, %s890_s12   ;;  %v848_v41 = vpop.permute.xlu0 %847  ;;  %v853_v43 = vpop.permute.xlu1 %852 }
 0x254   : > { %s1750_s3 = sshll.u32 %s1506_s23, 5 }
 0x255   : > { %s360_s22 = scalar_lea.vmem %s1734_s6, %s1750_s3 }
 0x257   : > { %v858_v42 = vpop.permute.xlu0 %857 }
 0x25b   : > { %v863_v51 = vpop.permute.xlu0 %862 }
 0x2fc   : > { %v1180_v44 = vpop.f32.mrb[8].mxu1 }
 0x2fd   : > { %v838_v45 = vsel %vm833_vm1, %v1180_v44, 0.0  ;;  %v814_v46 = vpop.f32.mrb[9].mxu1 }
 0x2fe   : > { %v866_v47 = vadd.f32 %v853_v43, %v838_v45  ;;  %v837_v48 = vsel %vm833_vm1, %v814_v46, 0.0 }
 0x2ff   : > { %v865_v49 = vadd.f32 %v848_v41, %v837_v48 }
 0x300   : > { %870 = vst.msk [vmem:[%s360_s22 + $0x8] sm:$0xff] %vm638_vm3, %v866_v47  ;;  %v1183_v50 = vpop.f32.mrb[10].mxu1 }
 0x301   : > { %869 = vst.msk [vmem:[%s360_s22] sm:$0xff] %vm638_vm3, %v865_v49  ;;  %v840_v52 = vsel %vm833_vm1, %v1183_v50, 0.0  ;;  %v824_v53 = vpop.f32.mrb[11].mxu1 }
 0x302   : > { %v868_v54 = vadd.f32 %v863_v51, %v840_v52  ;;  %v839_v55 = vsel %vm833_vm1, %v824_v53, 0.0 }
 0x303   : > { %v867_v56 = vadd.f32 %v858_v42, %v839_v55 }
 0x304   : > { %872 = vst.msk [vmem:[%s360_s22 + $0x18] sm:$0xff] %vm638_vm3, %v868_v54 }
 0x305   : > { %871 = vst.msk [vmem:[%s360_s22 + $0x10] sm:$0xff] %vm638_vm3, %v867_v56 }
 0x306 PF: > { %p1225_p4 = scmp.ge.s32.totalorder %s1390_s10, 2  ;;  %s943_s15 = sand.u32 1, %s1370_s27  }
 0x307   : > { %s944_s23 = scalar_lea.sflag [#allocation3], %s943_s15 }
 0x308   : > { %p1219_p7 = pnand %p1225_p4, %p1489_p8 }
 0x30a   : > { %1361 = dma.done.wait (!%p1219_p7), %s944_s23, 128  }
 0x30b   : > { %1363 = vsyncadd (!%p1219_p7), %s944_s23, 4294967168  ;;  %s953_s25 = scalar_lea.sflag [#allocation5], %s943_s15 }
 0x30c   : > { %1365 = dma.done.wait (!%p1219_p7), %s953_s25, 16  }
 0x30d   : > { %1367 = vsyncadd (!%p1219_p7), %s953_s25, 4294967280  ;;  %s25_s10 = sadd.s32 1, %s1390_s10   ;;  %s1751_s27 = smov %s1374_s28 }
 0x30e   : > { %p22_p9 = scmp.ge.s32.totalorder %s25_s10, 4   ;;  %s1752_s28 = smov %s1378_s29 }
 0x30f   : > { %s1753_s29 = smov %s1495_s18  ;;  %s1754_s30 = smov %s1386_s9 }
 0x310   : > { %s1755_s9 = smov %s1757_s13  ;;  %24 = sbr.rel (!%p22_p9) target bundleno = 11 (0xb), region = 108 }
 0x317   :  { %957 = vsyncpa [#allocation3], 1 }
 0x318   :  { %959 = vsyncpa [#allocation3 + $0x1], 1 }
 0x319   :  { %960 = vsyncpa [#allocation5], 1 }
 0x31a   :  { %962 = vsyncpa [#allocation5 + $0x1], 1 }

// kernel: tpu_custom_call.1
= control target key start
LH: loop header
LB: loop body
LE: loop exit
PB: predicated region body
PF: predicated region fallthrough
CT: control target
= control target key end

     0   :  { %s1728_s0 = inlined_call_operand.vmem [shape: f32[2,32,16], index: 0, kind: input, shape index: {}]   ;;  %s1729_s1 = inlined_call_operand.vmem [shape: f32[9,32], index: 1, kind: input, shape index: {}]   ;;  %s1730_s2 = inlined_call_operand.vmem [shape: f32[9,1], index: 2, kind: input, shape index: {}]   ;;  %s1731_s3 = inlined_call_operand.vmem [shape: f32[1,9,64], index: 3, kind: input, shape index: {}]   ;;  %s1732_s4 = inlined_call_operand.vmem [shape: f32[1,32,64], index: 4, kind: input, shape index: {}]   ;;  %s1733_s5 = inlined_call_operand.vmem [shape: f32[32,1], index: 5, kind: input, shape index: {}]   ;;  %s1734_s6 = inlined_call_operand.vmem [shape: f32[2,32,16], index: 6, kind: output, shape index: {0}]   ;;  %s1735_s7 = inlined_call_operand.hbm [shape: f32[2,8,16], index: 7, kind: output, shape index: {1}]   ;;  %s1736_s8 = inlined_call_operand.hbm [shape: s32[2,1,16], index: 8, kind: output, shape index: {2}]  }
   0x1   :  { %1739 = sst [smem:[#allocation8_spill]] %s1728_s0 }
   0x2   :  { %1740 = sst [smem:[#allocation9_spill]] %s1729_s1 }
   0x3   :  { %1741 = sst [smem:[#allocation10_spill]] %s1730_s2 }
   0x4   :  { %1742 = sst [smem:[#allocation11_spill]] %s1731_s3 }
   0x5   :  { %14 = vsyncpa [#allocation3], 0 }
   0x6   :  { %16 = vsyncpa [#allocation3 + $0x1], 0 }
   0x7   :  { %17 = vsyncpa [#allocation5], 0 }
   0x8   :  { %19 = vsyncpa [#allocation5 + $0x1], 0  ;;  %s1442_s27 = smov 0   ;;  %s1444_s28 = smov 0  }
   0x9   :  { %s1446_s29 = smov 0   ;;  %s1448_s30 = smov 0  }
   0xa   :  { %s1450_s9 = smov 0   ;;  %s1452_s10 = smov 0  }
   0xb LB: > { %s1059_s11 = sadd.s32 4294967295, %s1390_s10   ;;  %s1060_s12 = sadd.s32 4294967294, %s1390_s10   ;;  %s1390_s10 = sphi %s1452_s10, %s25_s10   ;;  %s1386_s9 = sphi %s1450_s9, %s1755_s9   ;;  %s1382_s30 = sphi %s1448_s30, %s1754_s30   ;;  %s1378_s29 = sphi %s1446_s29, %s1753_s29   ;;  %s1374_s28 = sphi %s1444_s28, %s1752_s28   ;;  %s1370_s27 = sphi %s1442_s27, %s1751_s27  }
   0xc   : > { %s37_s13 = sadd.s32 1, %s1386_s9  ;;  %s207_s14 = sadd.s32 1, %s1378_s29 }
   0xd   : > { %p39_p0 = scmp.ge.s32.totalorder %s37_s13, 2  ;;  %p217_p1 = scmp.ne.s32.totalorder %s1378_s29, %s1374_s28 }
   0xe   : > { %p218_p2 = scmp.eq.s32.totalorder %s1059_s11, 1  ;;  %p223_p3 = scmp.ne.s32.totalorder %s1374_s28, %s1370_s27 }
   0xf   : > { %s1757_s13 = smov (%p39_p0, %s37_s13), 0  ;;  %p224_p5 = scmp.eq.s32.totalorder %s1060_s12, 1 }
  0x10   : > { %p1482_p4 = por %p218_p2, %p217_p1  ;;  %s202_s16 = ssub.s32 %s1386_s9, %s1757_s13 }
  0x11   : > { %p1063_p6 = scmp.ge.s32.totalorder %s1390_s10, 1  ;;  %p205_p7 = scmp.eq.s32.totalorder %s202_s16, 0 }
  0x12   : > { %p1489_p8 = por %p224_p5, %p223_p3  ;;  %p296_p9 = scmp.lt.s32.totalorder %s1390_s10, 3 }
  0x13   : > { %s1495_s18 = scalar_select %p205_p7, %s1378_s29, %s207_s14  }
  0x14   : > { %p297_p10 = pnand %p1063_p6, %p296_p9 }
  0x15   : > { %p345_p11 = scmp.lt.s32.totalorder (!%p297_p10), %s1382_s30, 1  ;;  %s1745_s1 = sld [smem:[#allocation9_spill]] (!%p297_p10)  ;;  %vm379_vm0 = vcmask (!%p297_p10), 261120   ;;  %v1392_v1 = vmov (!%p297_p10), 0   ;;  %v841_v11 = vld [vmem:[%s1733_s5] sm:$0xff] (!%p297_p10)  ;;  %v843_v13 = vld [vmem:[%s1733_s5 + $0x10] sm:$0xff] (!%p297_p10)  ;;  %v461_v57 = vlaneseq (!%p297_p10) }
  0x16   : > { %300 = sbr.rel (%p297_p10) target bundleno = 774 (0x306), region = 44  ;;  %1278 = vset.pattern.permute.xlu0 (!%p297_p10), %v1392_v1  ;;  %s1746_s2 = sld [smem:[#allocation10_spill]] (!%p297_p10)  ;;  %v844_v15 = vld [vmem:[%s1733_s5 + $0x18] sm:$0xff] (!%p297_p10)  ;;  %vm504_vm1 = vcmask (!%p297_p10), 72704   ;;  %vm529_vm2 = vcmask (!%p297_p10), 1040384   ;;  %vm638_vm3 = vcmask (!%p297_p10), 130048  }
  0x17   : > { %s1747_s3 = sld [smem:[#allocation11_spill]] (!%p297_p10)  ;;  %s1748_s0 = sld [smem:[#allocation8_spill]] (!%p297_p10)  ;;  %vm1393_vm4 = vmmov (!%p297_p10), 1   ;;  %v731_v31 = vld [vmem:[%s1732_s4] sm:$0xff] (!%p297_p10)  ;;  %vm735_vm6 = vcmask (!%p297_p10), 523264   ;;  %v842_v32 = vld [vmem:[%s1733_s5 + $0x8] sm:$0xff] (!%p297_p10) }
  0x18   : > { %s1538_s20 = sand.u32 (!%p297_p10), 1, %s1374_s28   ;;  %vm1193_vm5 = vmpackc.low (!%p297_p10), %vm529_vm2, %vm1393_vm4  ;;  %v1567_v60 = vshrl.u32 (!%p297_p10), %v461_v57, 7  ;;  %s1101_s11 = sshll.u32 (!%p297_p10), %s1382_s30, 7 }
  0x19   : > { %s1738_s14 = scalar_lea.vmem (!%p297_p10), [#allocation4], %s1538_s20  ;;  %s1642_s16 = scalar_lea.hbm (!%p297_p10), %s1735_s7, %s1101_s11 }
  0x1a   : > { %v1570_v63 = vadd.s32 (!%p297_p10), 16, %v1567_v60 }
  0x1b   : > { %v365_v0 = vld [vmem:[%s1745_s1] sm:$0xff] (!%p297_p10)  ;;  %v366_v14 = vld [vmem:[%s1745_s1 + $0x8] sm:$0x1] (!%p297_p10) }
  0x1c   : > { %1143 = vmatprep.mubr.msk.f32.mxu0 (!%p297_p10), %vm379_vm0, %v365_v0  ;;  %v367_v2 = vld [vmem:[%s1746_s2] sm:$0xff] (!%p297_p10)  ;;  %v368_v4 = vld [vmem:[%s1746_s2 + $0x8] sm:$0x1] (!%p297_p10)  ;;  %v1573_v0 = vadd.s32 (!%p297_p10), 24, %v1567_v60 }
  0x1d   : > { %s1506_s23 = scalar_select %p345_p11, %s1382_s30, 1  ;;  %371 = vperm.xlu0 %1278, %v367_v2   ;;  %v470_v3 = vld [vmem:[%s1747_s3] sm:$0xff]  ;;  %v471_v5 = vld [vmem:[%s1747_s3 + $0x8] sm:$0x1]  ;;  %v1579_v2 = vadd.s32 56, %v1567_v60 }
  0x1e   : > { %472 = vxpose.xlu1.b32.start [1/2] (short) (narrow) %v470_v3, 64 }
  0x1f   : > { %s1737_s12 = sshll.u32 %s1506_s23, 5 }
  0x20   : > { %s352_s21 = scalar_lea.vmem %s1748_s0, %s1737_s12  ;;  %s1395_s0 = smov [#allocation2]  }
  0x21   : > { %v361_v6 = vld [vmem:[%s352_s21] sm:$0xff]  ;;  %v362_v7 = vld [vmem:[%s352_s21 + $0x8] sm:$0xff]  ;;  %v363_v8 = vld [vmem:[%s352_s21 + $0x10] sm:$0xff]  ;;  %376 = vperm.xlu0 %1278, %v368_v4   ;;  %v463_v4 = vadd.s32 8, %v1567_v60  ;;  %s1284_s1 = sshll.u32 %s1395_s0, 4  ;;  %s1285_s1 = int_to_ptr.vmem [resolvable:$false] %s1284_s1 }
  0x22   : > { %v1184_v9 = vpack.c.bf16 %v362_v7, %v361_v6  ;;  %v364_v10 = vld [vmem:[%s352_s21 + $0x18] sm:$0xff]  ;;  %473 = vxpose.xlu1.b32.end [2/2] (short) (narrow) %v471_v5, 64  ;;  %s1064_s21 = sshll.u32 %s1538_s20, 3  ;;  %v1585_v5 = vadd.s32 32, %v1567_v60  ;;  %v1588_v6 = vadd.s32 40, %v1567_v60  ;;  %s1286_s25 = scalar_lea.vmem %s1285_s1, 256 }
  0x23   : > { %v1188_v12 = vpack.c.bf16 %v364_v10, %v363_v8  ;;  %s1541_s22 = scalar_lea.vmem [#allocation2], %s1064_s21  ;;  %s885_s21 = scalar_lea.sflag [#allocation3], %s1538_s20 }
  0x24   : > { %1185 = vmatprep.subr.bf16.mxu0 %v1184_v9  ;;  %s906_s19 = sshll.u32 %s1541_s22, 4  ;;  %s907_s19 = int_to_ptr.vmem [resolvable:$true] %s906_s19 }
  0x25   : > { %1187 = vmatpush3.bf16.msra.mxu0 %v1184_v9  ;;  %847 = vperm.xlu0 %1278, %v841_v11   ;;  %s1280_s24 = scalar_lea.vmem %s907_s19, 128  ;;  %p1287_p1 = scmp.lt.s32.totalorder %s907_s19, %s1285_s1 }
  0x26   : > { %1189 = vmatprep.subr.bf16.mxu0 %v1188_v12  ;;  %p1281_p12 = scmp.ne.s32.totalorder %s907_s19, %s1280_s24  ;;  %p1288_p2 = scmp.lt.s32.totalorder %s1286_s25, %s1280_s24 }
  0x28   : > { %p1282_p13 = pnand %p1281_p12, %p1482_p4  ;;  %p1289_p3 = por %p1288_p2, %p1287_p1 }
  0x29   : > { %1191 = vmatpush3.bf16.msra.mxu0 %v1188_v12  ;;  %857 = vperm.xlu0 %1278, %v843_v13  }
  0x2a   : > { %p1283_p0 = pneg %p1282_p13 }
  0x2c   : > { %1144 = vmatmul.mubr.msk.f32.vlgmr.msra.gmra.mrb[0].mxu0 %vm379_vm0, %v366_v14  ;;  %p1290_p5 = pnand %p1289_p3, %p1283_p0 }
  0x2d   : > { %862 = vperm.xlu0 %1278, %v844_v15  }
  0x40   : > { %1279 = vset.pattern.permute.xlu1 %v1392_v1  ;;  %v1576_v1 = vadd.s32 48, %v1567_v60 }
  0x58   : > { %852 = vperm.xlu1 %1279, %v842_v32  }
  0x9c   : > { %v372_v19 = vpop.permute.xlu0 %371 }
  0x9e   : > { %v488_v16 = vpop.trf.xlu1 }
  0x9f   : > { %1150 = vmatprep.mubr.msk.f32.mxu1 %vm504_vm1, %v488_v16 }
  0xa0   : > { %v377_v21 = vpop.permute.xlu0 %376 }
  0xa2   : > { %v489_v17 = vpop.trf.xlu1 }
  0xa6   : > { %v490_v18 = vpop.trf.xlu1 }
  0xaa   : > { %v491_v20 = vpop.trf.xlu1 }
  0xae   : > { %v492_v25 = vpop.trf.xlu1 }
  0xb2   : > { %v493_v28 = vpop.trf.xlu1 }
  0xb6   : > { %v494_v29 = vpop.trf.xlu1 }
  0xba   : > { %v495_v30 = vpop.trf.xlu1 }
  0xff   : > { %v1145_v22 = vpop.f32.mrb[0].mxu0 }
 0x100   : > { %v458_v23 = vadd.f32 %v1145_v22, %v377_v21  ;;  %v452_v24 = vpop.f32.mrb[1].mxu0 }
 0x101   : > { %v453_v26 = vadd.f32 %v452_v24, %v372_v19 }
 0x103   : > { %v1192_v27 = vpack.c.bf16 %v458_v23, %v453_v26  ;;  %873 = vst.msk [vmem:[%s1541_s22] sm:$0xff] %vm638_vm3, %v453_v26 }
 0x105   : > { %1194 = vmatprep.subr.msk.bf16.mxu1 %vm1193_vm5, %v1192_v27 }
 0x106   : > { %1197 = vmatpush3.bf16.msk.msra.mxu1 %vm1193_vm5, %v1192_v27 }
 0x109   : > { %1151 = vmatmul.mubr.msk.f32.vlgmr.msra.gmra.mrb[0].mxu1 %vm504_vm1, %v489_v17 }
 0x10a   : > { %1153 = vmatprep.mubr.msk.f32.mxu1 %vm504_vm1, %v490_v18 }
 0x10d   : > { %1154 = vmatmul.mubr.msk.f32.gmra.mrb[2].mxu1 %vm504_vm1, %v491_v20 }
 0x10e   : > { %1156 = vmatprep.mubr.msk.f32.mxu1 %vm504_vm1, %v492_v25 }
 0x111   : > { %1157 = vmatmul.mubr.msk.f32.gmra.mrb[4].mxu1 %vm504_vm1, %v493_v28 }
 0x112   : > { %1159 = vmatprep.mubr.msk.f32.mxu1 %vm504_vm1, %v494_v29 }
 0x115   : > { %1160 = vmatmul.mubr.msk.f32.gmra.mrb[6].mxu1 %vm504_vm1, %v495_v30 }
 0x116   : > { %1178 = vmatprep.mubr.msk.f32.mxu1 %vm735_vm6, %v731_v31 }
 0x1dc   : > { %v1152_v33 = vpop.f32.mrb[0].mxu1 }
 0x1dd   : > { %v599_v34 = vpop.f32.mrb[1].mxu1  ;;  %v640_v38 = vsel %vm638_vm3, %v1152_v33, -inf }
 0x1de   : > { %v639_v41 = vsel %vm638_vm3, %v599_v34, -inf }
 0x1e0   : > { %v1155_v35 = vpop.f32.mrb[2].mxu1 }
 0x1e1   : > { %v609_v36 = vpop.f32.mrb[3].mxu1  ;;  %v642_v46 = vsel %vm638_vm3, %v1155_v35, -inf }
 0x1e2   : > { %v641_v50 = vsel %vm638_vm3, %v609_v36, -inf }
 0x1e4   : > { %v1158_v37 = vpop.f32.mrb[4].mxu1 }
 0x1e5   : > { %v645_v39 = vsel %vm638_vm3, %v1158_v37, -inf  ;;  %v619_v40 = vpop.f32.mrb[5].mxu1 }
 0x1e6   : > { %v646_v42 = vmax.f32 %v640_v38, %v645_v39  ;;  %v643_v43 = vsel %vm638_vm3, %v619_v40, -inf  ;;  %v732_v38 = vld [vmem:[%s1732_s4 + $0x8] sm:$0xff]  ;;  %v733_v39 = vld [vmem:[%s1732_s4 + $0x10] sm:$0xff] }
 0x1e7   : > { %v644_v44 = vmax.f32 %v639_v41, %v643_v43 }
 0x1e8   : > { %v1161_v45 = vpop.f32.mrb[6].mxu1 }
 0x1e9   : > { %v651_v47 = vmax.f32 %v644_v44, %v646_v42  ;;  %v649_v48 = vsel %vm638_vm3, %v1161_v45, -inf  ;;  %v629_v49 = vpop.f32.mrb[7].mxu1 }
 0x1ea   : > { %v650_v51 = vmax.f32 %v642_v46, %v649_v48  ;;  %v647_v52 = vsel %vm638_vm3, %v629_v49, -inf }
 0x1eb   : > { %v648_v53 = vmax.f32 %v641_v50, %v647_v52 }
 0x1ed   : > { %v652_v54 = vmax.f32 %v648_v53, %v650_v51 }
 0x1ef   : > { %v653_v55 = vmax.f32 %v651_v47, %v652_v54 }
 0x1f1   : > { %v654_v56 = vrot.slane %v653_v55, 4 }
 0x1f3   : > { %v655_v58 = vmax.f32 %v653_v55, %v654_v56 }
 0x1f5   : > { %v656_v59 = vrot.slane %v655_v58, 2 }
 0x1f7   : > { %v657_v61 = vmax.f32 %v655_v58, %v656_v59 }
 0x1f9   : > { %v658_v62 = vrot.slane %v657_v61, 1 }
 0x1fb   : > { %v1581_v3 = vmax.f32 %v657_v61, %v658_v62 }
 0x1fd   : > { %vm662_vm7 = vcmp.ge.f32.partialorder %v609_v36, %v1581_v3  ;;  %vm663_vm8 = vcmp.ge.f32.partialorder %v1155_v35, %v1581_v3  ;;  %vm666_vm9 = vcmp.ge.f32.partialorder %v629_v49, %v1581_v3  ;;  %vm667_vm10 = vcmp.ge.f32.partialorder %v1161_v45, %v1581_v3 }
 0x1fe   : > { %v670_v7 = vsel %vm662_vm7, %v1570_v63, 64  ;;  %v671_v8 = vsel %vm663_vm8, %v1573_v0, 64  ;;  %v674_v9 = vsel %vm666_vm9, %v1576_v1, 64  ;;  %v675_v10 = vsel %vm667_vm10, %v1579_v2, 64 }
 0x1ff   : > { %v678_v11 = vsel %vm638_vm3, %v670_v7, 2147483647  ;;  %v679_v12 = vsel %vm638_vm3, %v671_v8, 2147483647  ;;  %v686_v13 = vsel %vm638_vm3, %v674_v9, 2147483647  ;;  %vm660_vm11 = vcmp.ge.f32.partialorder %v599_v34, %v1581_v3 }
 0x200   : > { %vm687_vm12 = vcmp.lt.s32.totalorder %v678_v11, %v686_v13  ;;  %v689_v14 = vsel %vm638_vm3, %v675_v10, 2147483647  ;;  %vm661_vm13 = vcmp.ge.f32.partialorder %v1152_v33, %v1581_v3  ;;  %vm664_vm14 = vcmp.ge.f32.partialorder %v619_v40, %v1581_v3  ;;  %v734_v40 = vld [vmem:[%s1732_s4 + $0x18] sm:$0xff] }
 0x201   : > { %v688_v15 = vsel %vm687_vm12, %v678_v11, %v686_v13  ;;  %vm690_vm15 = vcmp.lt.s32.totalorder %v679_v12, %v689_v14  ;;  %vm665_vm0 = vcmp.ge.f32.partialorder %v1158_v37, %v1581_v3  ;;  %v668_v16 = vsel %vm660_vm11, %v1567_v60, 64 }
 0x202   : > { %v691_v17 = vsel %vm690_vm15, %v679_v12, %v689_v14  ;;  %v669_v18 = vsel %vm661_vm13, %v463_v4, 64  ;;  %v672_v19 = vsel %vm664_vm14, %v1585_v5, 64  ;;  %v673_v20 = vsel %vm665_vm0, %v1588_v6, 64 }
 0x203   : > { %vm694_vm1 = vcmp.lt.s32.totalorder %v688_v15, %v691_v17  ;;  %v676_v21 = vsel %vm638_vm3, %v668_v16, 2147483647  ;;  %v677_v22 = vsel %vm638_vm3, %v669_v18, 2147483647  ;;  %v680_v23 = vsel %vm638_vm3, %v672_v19, 2147483647 }
 0x204   : > { %v695_v24 = vsel %vm694_vm1, %v688_v15, %v691_v17  ;;  %vm681_vm2 = vcmp.lt.s32.totalorder %v676_v21, %v680_v23  ;;  %v683_v25 = vsel %vm638_vm3, %v673_v20, 2147483647  ;;  %vm874_vm11 = vcmask 122880  }
 0x205   : > { %v682_v26 = vsel %vm681_vm2, %v676_v21, %v680_v23  ;;  %vm684_vm4 = vcmp.lt.s32.totalorder %v677_v22, %v683_v25  ;;  %vm833_vm1 = vcmp.gt.f32.partialorder %v1581_v3, -inf  ;;  %v1394_v36 = vmov 1.0|1.0  }
 0x206   : > { %v685_v27 = vsel %vm684_vm4, %v677_v22, %v683_v25 }
 0x207   : > { %vm692_vm5 = vcmp.lt.s32.totalorder %v682_v26, %v685_v27 }
 0x208   : > { %v693_v28 = vsel %vm692_vm5, %v682_v26, %v685_v27 }
 0x209   : > { %vm696_vm7 = vcmp.lt.s32.totalorder %v693_v28, %v695_v24 }
 0x20a   : > { %v697_v29 = vsel %vm696_vm7, %v693_v28, %v695_v24 }
 0x20b   : > { %v698_v30 = vrot.slane %v697_v29, 4 }
 0x20d   : > { %vm699_vm8 = vcmp.lt.s32.totalorder %v697_v29, %v698_v30 }
 0x20e   : > { %v700_v31 = vsel %vm699_vm8, %v697_v29, %v698_v30 }
 0x20f   : > { %v701_v32 = vrot.slane %v700_v31, 2 }
 0x211   : > { %vm702_vm9 = vcmp.lt.s32.totalorder %v700_v31, %v701_v32 }
 0x212   : > { %v703_v33 = vsel %vm702_vm9, %v700_v31, %v701_v32 }
 0x213   : > { %v704_v34 = vrot.slane %v703_v33, 1 }
 0x215   : > { %vm705_vm10 = vcmp.lt.s32.totalorder %v703_v33, %v704_v34 }
 0x216   : > { %v706_v35 = vsel %vm705_vm10, %v703_v33, %v704_v34 }
 0x217   : > { %vm707_vm12 = vcmp.eq.s32.totalorder %v1567_v60, %v706_v35  ;;  %vm708_vm13 = vcmp.eq.s32.totalorder %v463_v4, %v706_v35  ;;  %vm709_vm14 = vcmp.eq.s32.totalorder %v1570_v63, %v706_v35  ;;  %vm710_vm15 = vcmp.eq.s32.totalorder %v1573_v0, %v706_v35 }
 0x218   : > { %vm1198_vm0 = vmpackc.low %vm708_vm13, %vm707_vm12  ;;  %v834_v37 = vsel %vm833_vm1, %v706_v35, 0  ;;  %vm711_vm4 = vcmp.eq.s32.totalorder %v1585_v5, %v706_v35  ;;  %vm712_vm5 = vcmp.eq.s32.totalorder %v1588_v6, %v706_v35  ;;  %vm713_vm8 = vcmp.eq.s32.totalorder %v1576_v1, %v706_v35 }
 0x219   : > { %1199 = vmatprep.subr.msk.bf16.mxu1 %vm1198_vm0, %v1394_v36  ;;  %vm1202_vm2 = vmpackc.low %vm710_vm15, %vm709_vm14  ;;  %875 = vst.msk [vmem:[%s1738_s14] sm:$0x1] %vm874_vm11, %v834_v37  ;;  %vm714_vm9 = vcmp.eq.s32.totalorder %v1579_v2, %v706_v35 }
 0x21a   : > { %1201 = vmatpush3.bf16.msk.msra.mxu1 %vm1198_vm0, %v1394_v36  ;;  %vm1206_vm7 = vmpackc.low %vm712_vm5, %vm711_vm4 }
 0x21b   : > { %1203 = vmatprep.subr.msk.bf16.mxu1 %vm1202_vm2, %v1394_v36  ;;  %vm1210_vm10 = vmpackc.low %vm714_vm9, %vm713_vm8 }
 0x21e   : > { %1205 = vmatpush3.bf16.msk.msra.mxu1 %vm1202_vm2, %v1394_v36 }
 0x21f   : > { %1207 = vmatprep.subr.msk.bf16.mxu1 %vm1206_vm7, %v1394_v36 }
 0x222   : > { %1209 = vmatpush3.bf16.msk.msra.mxu1 %vm1206_vm7, %v1394_v36 }
 0x223   : > { %1211 = vmatprep.subr.msk.bf16.mxu1 %vm1210_vm10, %v1394_v36 }
 0x226   : > { %1213 = vmatpush3.bf16.msk.msra.mxu1 %vm1210_vm10, %v1394_v36 }
 0x229   : > { %1179 = vmatmul.mubr.msk.f32.vlgmr.msra.gmra.mrb[8].mxu1 %vm735_vm6, %v732_v38 }
 0x22a   : > { %1181 = vmatprep.mubr.msk.f32.mxu1 %vm735_vm6, %v733_v39 }
 0x22d   : > { %1182 = vmatmul.mubr.msk.f32.gmra.mrb[10].mxu1 %vm735_vm6, %v734_v40 }
 0x22e   : > { %1293 = shalt.err (!%p1290_p5)
}
 0x22f   : > { %s1294_s12 = scalar_lea.hbm %s1642_s16, 128  ;;  %s1298_s0 = scalar_lea.hbm %s1735_s7, 256 }
 0x230   : > { %p1295_p6 = scmp.ne.s32.totalorder %s1642_s16, %s1294_s12  ;;  %p1299_p10 = scmp.lt.u32.totalorder %s1642_s16, %s1735_s7 }
 0x231   : > { %p1300_p11 = scmp.lt.u32.totalorder %s1298_s0, %s1294_s12  ;;  %p1302_p13 = scmp.lt.u32.totalorder %s1294_s12, %s1642_s16 }
 0x232   : > { %p1296_p7 = pnand %p1295_p6, %p1482_p4 }
 0x233   : > { %p1301_p12 = por %p1300_p11, %p1299_p10 }
 0x234   : > { %p1297_p9 = pneg %p1296_p7 }
 0x235   : > { %p1303_p0 = por %p1302_p13, %p1301_p12 }
 0x237   : > { %p1304_p1 = pnand %p1303_p0, %p1297_p9 }
 0x239   : > { %1307 = shalt.err (!%p1304_p1)
}
 0x23a   : > { %1214 = dma.vmem_to_hbm [thread:$0]  (%p1482_p4), %s907_s19, 128, %s1642_s16, %s885_s21  }
 0x23b   : > { %s1102_s11 = sshll.u32 %s1382_s30, 4  ;;  %s1749_s24 = scalar_lea.vmem [#allocation4], %s1538_s20 }
 0x23c   : > { %s920_s25 = sshll.u32 %s1749_s24, 4  ;;  %s1669_s0 = scalar_lea.hbm %s1736_s8, %s1102_s11  ;;  %s921_s25 = int_to_ptr.vmem [resolvable:$true] %s920_s25 }
 0x23d   : > { %s890_s12 = scalar_lea.sflag [#allocation5], %s1538_s20  ;;  %s1308_s26 = scalar_lea.vmem %s921_s25, 16 }
 0x23e   : > { %p1309_p2 = scmp.ne.s32.totalorder %s921_s25, %s1308_s26  ;;  %s1396_s1 = smov [#allocation4]  }
 0x23f   : > { %s1312_s2 = sshll.u32 %s1396_s1, 4  ;;  %s1313_s2 = int_to_ptr.vmem [resolvable:$false] %s1312_s2 }
 0x240   : > { %p1310_p3 = pnand %p1309_p2, %p1482_p4  ;;  %s1314_s3 = scalar_lea.vmem %s1313_s2, 32 }
 0x241   : > { %p1315_p6 = scmp.lt.s32.totalorder %s921_s25, %s1313_s2  ;;  %p1316_p7 = scmp.lt.s32.totalorder %s1314_s3, %s1308_s26 }
 0x242   : > { %p1311_p5 = pneg %p1310_p3 }
 0x243   : > { %p1317_p9 = por %p1316_p7, %p1315_p6 }
 0x245   : > { %p1318_p10 = pnand %p1317_p9, %p1311_p5 }
 0x247   : > { %1321 = shalt.err (!%p1318_p10)
}
 0x248   : > { %s1322_s30 = scalar_lea.hbm %s1669_s0, 16  ;;  %s1326_s19 = scalar_lea.hbm %s1736_s8, 32 }
 0x249   : > { %p1323_p11 = scmp.ne.s32.totalorder %s1669_s0, %s1322_s30  ;;  %p1327_p0 = scmp.lt.u32.totalorder %s1669_s0, %s1736_s8 }
 0x24a   : > { %p1328_p1 = scmp.lt.u32.totalorder %s1326_s19, %s1322_s30  ;;  %p1330_p3 = scmp.lt.u32.totalorder %s1322_s30, %s1669_s0 }
 0x24b   : > { %p1324_p12 = pnand %p1323_p11, %p1482_p4 }
 0x24c   : > { %p1329_p2 = por %p1328_p1, %p1327_p0 }
 0x24d   : > { %p1325_p13 = pneg %p1324_p12 }
 0x24e   : > { %p1331_p5 = por %p1330_p3, %p1329_p2 }
 0x250   : > { %p1332_p6 = pnand %p1331_p5, %p1325_p13 }
 0x252   : > { %1335 = shalt.err (!%p1332_p6)
}
 0x253   : > { %1215 = dma.vmem_to_hbm [thread:$0]  (%p1482_p4), %s921_s25, 16, %s1669_s0, %s890_s12   ;;  %v848_v41 = vpop.permute.xlu0 %847  ;;  %v853_v43 = vpop.permute.xlu1 %852 }
 0x254   : > { %s1750_s3 = sshll.u32 %s1506_s23, 5 }
 0x255   : > { %s360_s22 = scalar_lea.vmem %s1734_s6, %s1750_s3 }
 0x257   : > { %v858_v42 = vpop.permute.xlu0 %857 }
 0x25b   : > { %v863_v51 = vpop.permute.xlu0 %862 }
 0x2fc   : > { %v1180_v44 = vpop.f32.mrb[8].mxu1 }
 0x2fd   : > { %v838_v45 = vsel %vm833_vm1, %v1180_v44, 0.0  ;;  %v814_v46 = vpop.f32.mrb[9].mxu1 }
 0x2fe   : > { %v866_v47 = vadd.f32 %v853_v43, %v838_v45  ;;  %v837_v48 = vsel %vm833_vm1, %v814_v46, 0.0 }
 0x2ff   : > { %v865_v49 = vadd.f32 %v848_v41, %v837_v48 }
 0x300   : > { %870 = vst.msk [vmem:[%s360_s22 + $0x8] sm:$0xff] %vm638_vm3, %v866_v47  ;;  %v1183_v50 = vpop.f32.mrb[10].mxu1 }
 0x301   : > { %869 = vst.msk [vmem:[%s360_s22] sm:$0xff] %vm638_vm3, %v865_v49  ;;  %v840_v52 = vsel %vm833_vm1, %v1183_v50, 0.0  ;;  %v824_v53 = vpop.f32.mrb[11].mxu1 }
 0x302   : > { %v868_v54 = vadd.f32 %v863_v51, %v840_v52  ;;  %v839_v55 = vsel %vm833_vm1, %v824_v53, 0.0 }
 0x303   : > { %v867_v56 = vadd.f32 %v858_v42, %v839_v55 }
 0x304   : > { %872 = vst.msk [vmem:[%s360_s22 + $0x18] sm:$0xff] %vm638_vm3, %v868_v54 }
 0x305   : > { %871 = vst.msk [vmem:[%s360_s22 + $0x10] sm:$0xff] %vm638_vm3, %v867_v56 }
 0x306 PF: > { %p1225_p4 = scmp.ge.s32.totalorder %s1390_s10, 2  ;;  %s943_s15 = sand.u32 1, %s1370_s27  }
 0x307   : > { %s944_s23 = scalar_lea.sflag [#allocation3], %s943_s15 }
 0x308   : > { %p1219_p7 = pnand %p1225_p4, %p1489_p8 }
 0x30a   : > { %1361 = dma.done.wait (!%p1219_p7), %s944_s23, 128  }
 0x30b   : > { %1363 = vsyncadd (!%p1219_p7), %s944_s23, 4294967168  ;;  %s953_s25 = scalar_lea.sflag [#allocation5], %s943_s15 }
 0x30c   : > { %1365 = dma.done.wait (!%p1219_p7), %s953_s25, 16  }
 0x30d   : > { %1367 = vsyncadd (!%p1219_p7), %s953_s25, 4294967280  ;;  %s25_s10 = sadd.s32 1, %s1390_s10   ;;  %s1751_s27 = smov %s1374_s28 }
 0x30e   : > { %p22_p9 = scmp.ge.s32.totalorder %s25_s10, 4   ;;  %s1752_s28 = smov %s1378_s29 }
 0x30f   : > { %s1753_s29 = smov %s1495_s18  ;;  %s1754_s30 = smov %s1386_s9 }
 0x310   : > { %s1755_s9 = smov %s1757_s13  ;;  %24 = sbr.rel (!%p22_p9) target bundleno = 11 (0xb), region = 108 }
 0x317   :  { %957 = vsyncpa [#allocation3], 1 }
 0x318   :  { %959 = vsyncpa [#allocation3 + $0x1], 1 }
 0x319   :  { %960 = vsyncpa [#allocation5], 1 }
 0x31a   :  { %962 = vsyncpa [#allocation5 + $0x1], 1 }

</bundles_post_ra>
